<compile_context>
chip_gen: v6e
topology: v6e:2x2x1
jax: 0.10.0
libtpu: 0.0.40
codegen_flags: <defaults>
</compile_context>

<pallas_src>
import functools

import jax
import jax.numpy as jnp
from jax.experimental import pallas as pl
from jax.experimental.pallas import tpu as pltpu


def _round_up(x, m):
    return ((x + m - 1) // m) * m


_VMEM_BUDGET = 40 * 1024 * 1024      # static cap used when choosing TB
_VMEM_LIMIT = 48 * 1024 * 1024       # scoped VMEM limit handed to Mosaic


def _vmem_estimate_bytes(TB, S, D, L, L_pad, H_enc, H_dec):
    """Conservative per-step VMEM estimate: double-buffered I/O tiles +
    resident weights (x2) + in-kernel f32/bf16 temporaries."""
    io = (TB * D * 4                 # x tile, f32
          + S * TB * L * 4           # eps tile, f32
          + 2 * TB * L_pad * 2       # mu + logvar tiles, bf16
          + S * TB * L_pad * 2       # z tile, bf16
          + S * TB * D * 2)          # probs tile, bf16
    weights = (2 * (D * H_enc + H_enc * 2 * L_pad + L_pad * H_dec + H_dec * D)
               + 4 * (H_enc + 2 * L_pad + H_dec + D))
    temps = (TB * (H_enc * 4 + 2 * L_pad * 12)            # h, ml, mu/logvar/std
             + S * TB * (L_pad * 6 + H_dec * 6 + D * 8))  # z, hd, logits/probs f32
    return 2 * (io + weights) + temps


def _vae_kernel(x_ref, eps_ref,
                w1e_ref, b1e_ref, wml_ref, bml_ref,
                w1d_ref, b1d_ref, w2d_ref, b2d_ref,
                mu_ref, logvar_ref, z_ref, probs_ref):
    """Fused VAE forward for one batch tile: encoder, S reparameterized samples,
    one batched decode over all S*TB rows."""
    S, TB, L = eps_ref.shape
    L_pad = mu_ref.shape[-1]
    D = probs_ref.shape[-1]

    # ---- encoder ----
    x = x_ref[...].astype(jnp.bfloat16)          # f32 HBM read, cast on-chip
    h = jnp.dot(x, w1e_ref[...], preferred_element_type=jnp.float32) + b1e_ref[...]
    h = jnp.maximum(h, 0.0).astype(jnp.bfloat16)

    # fused (mu | logvar) projection: one matmul, sliced at the 128-lane boundary
    ml = jnp.dot(h, wml_ref[...], preferred_element_type=jnp.float32) + bml_ref[...]
    mu = ml[:, :L_pad]
    logvar = ml[:, L_pad:]
    # TODO(synk): logvar is fed unclamped to exp, matching the PyTorch module.
    std = jnp.exp(0.5 * logvar)

    mu_ref[...] = mu.astype(jnp.bfloat16)
    logvar_ref[...] = logvar.astype(jnp.bfloat16)

    # ---- rsample: all S draws at once ----
    eps = eps_ref[...]                           # [S, TB, L] f32, unpadded lanes
    if L_pad > L:
        # zero-extend to the 128-lane layout in-register; padded lanes have
        # mu=0 and std=1 (zero weight/bias columns), so z stays exactly 0 there.
        eps = jnp.concatenate(
            [eps, jnp.zeros((S, TB, L_pad - L), jnp.float32)], axis=-1)
    z = mu[None, :, :] + std[None, :, :] * eps   # [S, TB, L_pad] f32
    z_ref[...] = z.astype(jnp.bfloat16)

    # ---- decoder: one batched pass over all S*TB rows ----
    z2 = z.reshape(S * TB, L_pad).astype(jnp.bfloat16)
    hd = jnp.dot(z2, w1d_ref[...], preferred_element_type=jnp.float32) + b1d_ref[...]
    hd = jnp.maximum(hd, 0.0).astype(jnp.bfloat16)
    logits = jnp.dot(hd, w2d_ref[...], preferred_element_type=jnp.float32) + b2d_ref[...]
    probs = jax.nn.sigmoid(logits).astype(jnp.bfloat16)      # Bernoulli mean, bf16
    probs_ref[...] = probs.reshape(S, TB, D)                 # lane-dense slab store


def prepack_params(params):
    """One-time packing of raw VAE params for the kernel: fused (mu|logvar)
    projection zero-padded to a 128-lane boundary, bf16 matmul weights, f32
    (1, N) biases. Call once at init and reuse — keeps the pad/concat/cast work
    off the per-forward path."""
    (w1e, b1e, wmu, bmu, wlv, blv, w1d, b1d, w2d, b2d) = params
    L = wmu.shape[1]
    L_pad = _round_up(L, 128)
    bf = jnp.bfloat16

    def bias2d(b):  # accepts (N,) or (1, N)
        return jnp.asarray(b, jnp.float32).reshape(1, -1)

    wml = jnp.concatenate(
        [jnp.pad(wmu, ((0, 0), (0, L_pad - L))),
         jnp.pad(wlv, ((0, 0), (0, L_pad - L)))], axis=1).astype(bf)
    bml = jnp.concatenate(
        [jnp.pad(bias2d(bmu), ((0, 0), (0, L_pad - L))),
         jnp.pad(bias2d(blv), ((0, 0), (0, L_pad - L)))], axis=1)
    return (w1e.astype(bf), bias2d(b1e),
            wml, bml,
            jnp.pad(w1d, ((0, L_pad - L), (0, 0))).astype(bf), bias2d(b1d),
            w2d.astype(bf), bias2d(b2d))


@functools.partial(jax.jit, static_argnames=("tb_max",))
def vae_forward(x_nchw, eps, packed_params, *, tb_max=512):
    """x_nchw: [B, C, H, W] f32; eps: [S, B, L] f32 standard-normal draws;
    packed_params: output of prepack_params.

    Returns (mu, logvar, z, probs) in bfloat16: the parameters of enc_dist, the
    latent samples, and the Bernoulli means of dec_dist.
    """
    (w1e_b, b1e_f, wml, bml, w1d_p, b1d_f, w2d_b, b2d_f) = packed_params
    B = x_nchw.shape[0]
    D = x_nchw.shape[1] * x_nchw.shape[2] * x_nchw.shape[3]
    S, B_eps, L = eps.shape
    assert B_eps == B
    L_pad = wml.shape[1] // 2
    H_enc = w1e_b.shape[1]
    H_dec = w1d_p.shape[1]
    assert w1e_b.shape[0] == D and w2d_b.shape[1] == D

    # Batch tiling: TB multiple of 16 (bf16 sublane tile); aim for >= 2 grid
    # steps when the batch allows (megacore / v7x two-TC sharding via the
    # "parallel" axis); cap TB by the static VMEM budget (probs tile ~ S*TB*D).
    B_pad = _round_up(B, 16)
    TB = max(16, min(tb_max, _round_up(max(B_pad // 2, 16), 16)))
    while TB > 16 and _vmem_estimate_bytes(TB, S, D, L, L_pad, H_enc, H_dec) > _VMEM_BUDGET:
        TB = max(16, _round_up(TB // 2, 16))
    B_pad = _round_up(B_pad, TB)
    grid = (B_pad // TB,)

    x_flat = x_nchw.reshape(B, D)        # row-major view (torch .view(B, -1)); stays f32
    if B_pad != B:                       # only pad the batch dim when needed
        x_flat = jnp.pad(x_flat, ((0, B_pad - B), (0, 0)))
        eps = jnp.pad(eps, ((0, 0), (0, B_pad - B), (0, 0)))

    inputs = (x_flat, eps, w1e_b, b1e_f, wml, bml, w1d_p, b1d_f, w2d_b, b2d_f)

    def resident(shape):
        nd = len(shape)
        return pl.BlockSpec(shape, lambda i, _n=nd: (0,) * _n)  # VMEM-resident across grid

    in_specs = [
        pl.BlockSpec((TB, D), lambda i: (i, 0)),             # x: batch-tiled, f32
        pl.BlockSpec((S, TB, L), lambda i: (0, i, 0)),       # eps: batch-tiled, unpadded lanes
        resident(w1e_b.shape), resident(b1e_f.shape),
        resident(wml.shape), resident(bml.shape),
        resident(w1d_p.shape), resident(b1d_f.shape),
        resident(w2d_b.shape), resident(b2d_f.shape),
    ]
    out_shape = (
        jax.ShapeDtypeStruct((B_pad, L_pad), jnp.bfloat16),      # mu
        jax.ShapeDtypeStruct((B_pad, L_pad), jnp.bfloat16),      # logvar
        jax.ShapeDtypeStruct((S, B_pad, L_pad), jnp.bfloat16),   # z samples
        jax.ShapeDtypeStruct((S, B_pad, D), jnp.bfloat16),       # decoder probs
    )
    out_specs = (
        pl.BlockSpec((TB, L_pad), lambda i: (i, 0)),
        pl.BlockSpec((TB, L_pad), lambda i: (i, 0)),
        pl.BlockSpec((S, TB, L_pad), lambda i: (0, i, 0)),
        pl.BlockSpec((S, TB, D), lambda i: (0, i, 0)),
    )

    mu_p, logvar_p, z_p, probs_p = pl.pallas_call(
        _vae_kernel,
        grid=grid,
        in_specs=in_specs,
        out_specs=out_specs,
        out_shape=out_shape,
        compiler_params=pltpu.CompilerParams(
            dimension_semantics=("parallel",),
            vmem_limit_bytes=_VMEM_LIMIT),
    )(*inputs)

    # Strip padding immediately at the call site (keep this slicing adjacent to
    # the pallas_call so padded rows/lanes never leak into later reductions).
    return (mu_p[:B, :L], logvar_p[:B, :L], z_p[:, :B, :L], probs_p[:, :B, :])


def init_params(key, in_dim, enc_hidden, latent, dec_hidden):
    ks = jax.random.split(key, 6)
    scale = 0.05
    w1e = scale * jax.random.normal(ks[0], (in_dim, enc_hidden), jnp.float32)
    b1e = jnp.zeros((1, enc_hidden), jnp.float32)
    wmu = scale * jax.random.normal(ks[1], (enc_hidden, latent), jnp.float32)
    bmu = jnp.zeros((1, latent), jnp.float32)
    wlv = scale * jax.random.normal(ks[2], (enc_hidden, latent), jnp.float32)
    blv = jnp.zeros((1, latent), jnp.float32)
    w1d = scale * jax.random.normal(ks[3], (latent, dec_hidden), jnp.float32)
    b1d = jnp.zeros((1, dec_hidden), jnp.float32)
    w2d = scale * jax.random.normal(ks[4], (dec_hidden, in_dim), jnp.float32)
    b2d = jnp.zeros((1, in_dim), jnp.float32)
    return (w1e, b1e, wmu, bmu, wlv, blv, w1d, b1d, w2d, b2d)


def vae_forward_ref(x_nchw, eps, params):
    """Pure-JAX reference mirroring the kernel's math (bf16 MXU inputs, f32 acc),
    kept in f32 outputs; kernel outputs differ only by the final bf16 rounding."""
    (w1e, b1e, wmu, bmu, wlv, blv, w1d, b1d, w2d, b2d) = params
    bf = jnp.bfloat16
    B = x_nchw.shape[0]
    S = eps.shape[0]
    x = x_nchw.reshape(B, -1).astype(bf)
    h = jnp.dot(x, w1e.astype(bf), preferred_element_type=jnp.float32) + b1e
    h = jnp.maximum(h, 0.0).astype(bf)
    mu = jnp.dot(h, wmu.astype(bf), preferred_element_type=jnp.float32) + bmu
    logvar = jnp.dot(h, wlv.astype(bf), preferred_element_type=jnp.float32) + blv
    std = jnp.exp(0.5 * logvar)
    z = mu[None] + std[None] * eps                              # [S, B, L]
    z2 = z.reshape(S * B, -1).astype(bf)
    hd = jnp.dot(z2, w1d.astype(bf), preferred_element_type=jnp.float32) + b1d
    hd = jnp.maximum(hd, 0.0).astype(bf)
    logits = jnp.dot(hd, w2d.astype(bf), preferred_element_type=jnp.float32) + b2d
    probs = jax.nn.sigmoid(logits).reshape(S, B, -1)
    return mu, logvar, z, probs


if __name__ == "__main__":
    # small shapes consistent with the module: x is [B, C, H, W]
    B, C, H, W = 2, 4, 16, 16
    D = C * H * W                  # 1024
    LATENT = 32                    # hidden_dim
    ENC_HIDDEN = 128
    DEC_HIDDEN = 128
    NUM_SAMPLES = 2

    key = jax.random.PRNGKey(0)
    kx, keps, kp = jax.random.split(key, 3)
    x = jax.random.normal(kx, (B, C, H, W), jnp.float32)
    eps = jax.random.normal(keps, (NUM_SAMPLES, B, LATENT), jnp.float32)
    params = init_params(kp, D, ENC_HIDDEN, LATENT, DEC_HIDDEN)

    # pack weights once (outside the per-call jitted forward)
    packed = jax.block_until_ready(prepack_params(params))

    mu, logvar, z, probs = jax.block_until_ready(vae_forward(x, eps, packed))
    mu_r, logvar_r, z_r, probs_r = vae_forward_ref(x, eps, params)

    assert mu.shape == (B, LATENT) and logvar.shape == (B, LATENT)
    assert z.shape == (NUM_SAMPLES, B, LATENT)
    assert probs.shape == (NUM_SAMPLES, B, D)
    assert mu.dtype == jnp.bfloat16 and probs.dtype == jnp.bfloat16

    def close(a, b):   # kernel outputs are bf16; tolerance covers the rounding
        return jnp.allclose(a.astype(jnp.float32), b, atol=1e-2, rtol=1e-2)

    assert close(mu, mu_r)
    assert close(logvar, logvar_r)
    assert close(z, z_r)
    assert close(probs, probs_r)

    print("KERNEL_OK")
</pallas_src>

<mosaic_0001>
module attributes {stable_mosaic.version = 11 : i64} {
  func.func @_vae_kernel(%arg0: i32, %arg1: memref<16x1024xf32, #tpu.memory_space<vmem>>, %arg2: memref<2x16x32xf32, #tpu.memory_space<vmem>>, %arg3: memref<1024x128xbf16, #tpu.memory_space<vmem>>, %arg4: memref<1x128xf32, #tpu.memory_space<vmem>>, %arg5: memref<128x256xbf16, #tpu.memory_space<vmem>>, %arg6: memref<1x256xf32, #tpu.memory_space<vmem>>, %arg7: memref<128x128xbf16, #tpu.memory_space<vmem>>, %arg8: memref<1x128xf32, #tpu.memory_space<vmem>>, %arg9: memref<128x1024xbf16, #tpu.memory_space<vmem>>, %arg10: memref<1x1024xf32, #tpu.memory_space<vmem>>, %arg11: memref<16x128xbf16, #tpu.memory_space<vmem>>, %arg12: memref<16x128xbf16, #tpu.memory_space<vmem>>, %arg13: memref<2x16x128xbf16, #tpu.memory_space<vmem>>, %arg14: memref<2x16x1024xbf16, #tpu.memory_space<vmem>>) attributes {dimension_semantics = [#tpu.dimension_semantics<parallel>], iteration_bounds = array<i64: 1>, scalar_prefetch = 0 : i64, scratch_operands = 0 : i64, tpu.core_type = #tpu.core_type<tc>, window_params = [{transform_indices = @transform_0, window_bounds = array<i64: 16, 1024>}, {transform_indices = @transform_1, window_bounds = array<i64: 2, 16, 32>}, {pipeline_mode = #tpu.pipeline_mode<synchronous>, transform_indices = @transform_2, window_bounds = array<i64: 1024, 128>}, {pipeline_mode = #tpu.pipeline_mode<synchronous>, transform_indices = @transform_3, window_bounds = array<i64: 1, 128>}, {pipeline_mode = #tpu.pipeline_mode<synchronous>, transform_indices = @transform_4, window_bounds = array<i64: 128, 256>}, {pipeline_mode = #tpu.pipeline_mode<synchronous>, transform_indices = @transform_5, window_bounds = array<i64: 1, 256>}, {pipeline_mode = #tpu.pipeline_mode<synchronous>, transform_indices = @transform_6, window_bounds = array<i64: 128, 128>}, {pipeline_mode = #tpu.pipeline_mode<synchronous>, transform_indices = @transform_7, window_bounds = array<i64: 1, 128>}, {pipeline_mode = #tpu.pipeline_mode<synchronous>, transform_indices = @transform_8, window_bounds = array<i64: 128, 1024>}, {pipeline_mode = #tpu.pipeline_mode<synchronous>, transform_indices = @transform_9, window_bounds = array<i64: 1, 1024>}, {transform_indices = @transform_10, window_bounds = array<i64: 16, 128>}, {transform_indices = @transform_11, window_bounds = array<i64: 16, 128>}, {transform_indices = @transform_12, window_bounds = array<i64: 2, 16, 128>}, {transform_indices = @transform_13, window_bounds = array<i64: 2, 16, 1024>}]} {
    %c0 = arith.constant 0 : index
    %c0_0 = arith.constant 0 : index
    %0 = vector.load %arg1[%c0, %c0_0] : memref<16x1024xf32, #tpu.memory_space<vmem>>, vector<16x1024xf32>
    %1 = arith.truncf %0 : vector<16x1024xf32> to vector<16x1024xbf16>
    %c0_1 = arith.constant 0 : index
    %c0_2 = arith.constant 0 : index
    %2 = vector.load %arg3[%c0_1, %c0_2] : memref<1024x128xbf16, #tpu.memory_space<vmem>>, vector<1024x128xbf16>
    %cst = arith.constant dense<0.000000e+00> : vector<16x128xf32>
    %3 = tpu.matmul %1, %2, %cst {dimension_numbers = #tpu.dot_dimension_numbers<[1], [0], [0], [1], [0, 0, 1, 1], [], []>} : vector<16x1024xbf16>, vector<1024x128xbf16>, vector<16x128xf32> -> vector<16x128xf32>
    %c0_3 = arith.constant 0 : index
    %c0_4 = arith.constant 0 : index
    %4 = vector.load %arg4[%c0_3, %c0_4] : memref<1x128xf32, #tpu.memory_space<vmem>>, vector<1x128xf32>
    %5 = vector.broadcast %4 : vector<1x128xf32> to vector<16x128xf32>
    %6 = arith.addf %3, %5 : vector<16x128xf32>
    %cst_5 = arith.constant 0.000000e+00 : f32
    %7 = vector.broadcast %cst_5 : f32 to vector<16x128xf32>
    %8 = arith.maximumf %6, %7 : vector<16x128xf32>
    %9 = arith.truncf %8 : vector<16x128xf32> to vector<16x128xbf16>
    %c0_6 = arith.constant 0 : index
    %c0_7 = arith.constant 0 : index
    %10 = vector.load %arg5[%c0_6, %c0_7] : memref<128x256xbf16, #tpu.memory_space<vmem>>, vector<128x256xbf16>
    %cst_8 = arith.constant dense<0.000000e+00> : vector<16x256xf32>
    %11 = tpu.matmul %9, %10, %cst_8 {dimension_numbers = #tpu.dot_dimension_numbers<[1], [0], [0], [1], [0, 0, 1, 1], [], []>} : vector<16x128xbf16>, vector<128x256xbf16>, vector<16x256xf32> -> vector<16x256xf32>
    %c0_9 = arith.constant 0 : index
    %c0_10 = arith.constant 0 : index
    %12 = vector.load %arg6[%c0_9, %c0_10] : memref<1x256xf32, #tpu.memory_space<vmem>>, vector<1x256xf32>
    %13 = vector.broadcast %12 : vector<1x256xf32> to vector<16x256xf32>
    %14 = arith.addf %11, %13 : vector<16x256xf32>
    %15 = vector.extract_strided_slice %14 {offsets = [0, 0], sizes = [16, 128], strides = [1, 1]} : vector<16x256xf32> to vector<16x128xf32>
    %16 = vector.extract_strided_slice %14 {offsets = [0, 128], sizes = [16, 128], strides = [1, 1]} : vector<16x256xf32> to vector<16x128xf32>
    %cst_11 = arith.constant 5.000000e-01 : f32
    %17 = vector.broadcast %cst_11 : f32 to vector<16x128xf32>
    %18 = arith.mulf %17, %16 : vector<16x128xf32>
    %19 = math.exp %18 : vector<16x128xf32>
    %20 = arith.truncf %15 : vector<16x128xf32> to vector<16x128xbf16>
    %c0_12 = arith.constant 0 : index
    %c0_13 = arith.constant 0 : index
    %21 = vector.load %arg11[%c0_12, %c0_13] : memref<16x128xbf16, #tpu.memory_space<vmem>>, vector<16x128xbf16>
    tpu.vector_store %arg11[%c0_12, %c0_13], %20 {strides = array<i32>} : memref<16x128xbf16, #tpu.memory_space<vmem>>, vector<16x128xbf16>,
    %22 = arith.truncf %16 : vector<16x128xf32> to vector<16x128xbf16>
    %c0_14 = arith.constant 0 : index
    %c0_15 = arith.constant 0 : index
    %23 = vector.load %arg12[%c0_14, %c0_15] : memref<16x128xbf16, #tpu.memory_space<vmem>>, vector<16x128xbf16>
    tpu.vector_store %arg12[%c0_14, %c0_15], %22 {strides = array<i32>} : memref<16x128xbf16, #tpu.memory_space<vmem>>, vector<16x128xbf16>,
    %c0_16 = arith.constant 0 : index
    %c0_17 = arith.constant 0 : index
    %c0_18 = arith.constant 0 : index
    %24 = vector.load %arg2[%c0_16, %c0_17, %c0_18] : memref<2x16x32xf32, #tpu.memory_space<vmem>>, vector<2x16x32xf32>
    %cst_19 = arith.constant 0.000000e+00 : f32
    %25 = vector.broadcast %cst_19 : f32 to vector<2x16x96xf32>
    %26 = tpu.concatenate %24, %25 in 2 : vector<2x16x32xf32>, vector<2x16x96xf32> -> vector<2x16x128xf32>
    %27 = vector.shape_cast %15 : vector<16x128xf32> to vector<1x16x128xf32>
    %28 = vector.shape_cast %19 : vector<16x128xf32> to vector<1x16x128xf32>
    %29 = vector.broadcast %28 : vector<1x16x128xf32> to vector<2x16x128xf32>
    %30 = arith.mulf %29, %26 : vector<2x16x128xf32>
    %31 = vector.broadcast %27 : vector<1x16x128xf32> to vector<2x16x128xf32>
    %32 = arith.addf %31, %30 : vector<2x16x128xf32>
    %33 = arith.truncf %32 : vector<2x16x128xf32> to vector<2x16x128xbf16>
    %c0_20 = arith.constant 0 : index
    %c0_21 = arith.constant 0 : index
    %c0_22 = arith.constant 0 : index
    %34 = vector.load %arg13[%c0_20, %c0_21, %c0_22] : memref<2x16x128xbf16, #tpu.memory_space<vmem>>, vector<2x16x128xbf16>
    tpu.vector_store %arg13[%c0_20, %c0_21, %c0_22], %33 {strides = array<i32>} : memref<2x16x128xbf16, #tpu.memory_space<vmem>>, vector<2x16x128xbf16>,
    %35 = vector.shape_cast %32 : vector<2x16x128xf32> to vector<32x128xf32>
    %36 = arith.truncf %35 : vector<32x128xf32> to vector<32x128xbf16>
    %c0_23 = arith.constant 0 : index
    %c0_24 = arith.constant 0 : index
    %37 = vector.load %arg7[%c0_23, %c0_24] : memref<128x128xbf16, #tpu.memory_space<vmem>>, vector<128x128xbf16>
    %cst_25 = arith.constant dense<0.000000e+00> : vector<32x128xf32>
    %38 = tpu.matmul %36, %37, %cst_25 {dimension_numbers = #tpu.dot_dimension_numbers<[1], [0], [0], [1], [0, 0, 1, 1], [], []>} : vector<32x128xbf16>, vector<128x128xbf16>, vector<32x128xf32> -> vector<32x128xf32>
    %c0_26 = arith.constant 0 : index
    %c0_27 = arith.constant 0 : index
    %39 = vector.load %arg8[%c0_26, %c0_27] : memref<1x128xf32, #tpu.memory_space<vmem>>, vector<1x128xf32>
    %40 = vector.broadcast %39 : vector<1x128xf32> to vector<32x128xf32>
    %41 = arith.addf %38, %40 : vector<32x128xf32>
    %cst_28 = arith.constant 0.000000e+00 : f32
    %42 = vector.broadcast %cst_28 : f32 to vector<32x128xf32>
    %43 = arith.maximumf %41, %42 : vector<32x128xf32>
    %44 = arith.truncf %43 : vector<32x128xf32> to vector<32x128xbf16>
    %c0_29 = arith.constant 0 : index
    %c0_30 = arith.constant 0 : index
    %45 = vector.load %arg9[%c0_29, %c0_30] : memref<128x1024xbf16, #tpu.memory_space<vmem>>, vector<128x1024xbf16>
    %cst_31 = arith.constant dense<0.000000e+00> : vector<32x1024xf32>
    %46 = tpu.matmul %44, %45, %cst_31 {dimension_numbers = #tpu.dot_dimension_numbers<[1], [0], [0], [1], [0, 0, 1, 1], [], []>} : vector<32x128xbf16>, vector<128x1024xbf16>, vector<32x1024xf32> -> vector<32x1024xf32>
    %c0_32 = arith.constant 0 : index
    %c0_33 = arith.constant 0 : index
    %47 = vector.load %arg10[%c0_32, %c0_33] : memref<1x1024xf32, #tpu.memory_space<vmem>>, vector<1x1024xf32>
    %48 = vector.broadcast %47 : vector<1x1024xf32> to vector<32x1024xf32>
    %49 = arith.addf %46, %48 : vector<32x1024xf32>
    %50 = arith.negf %49 : vector<32x1024xf32>
    %51 = math.exp %50 : vector<32x1024xf32>
    %cst_34 = arith.constant 1.000000e+00 : f32
    %52 = vector.broadcast %cst_34 : f32 to vector<32x1024xf32>
    %53 = arith.addf %52, %51 : vector<32x1024xf32>
    %54 = arith.divf %52, %53 : vector<32x1024xf32>
    %55 = arith.truncf %54 : vector<32x1024xf32> to vector<32x1024xbf16>
    %56 = vector.shape_cast %55 : vector<32x1024xbf16> to vector<2x16x1024xbf16>
    %c0_35 = arith.constant 0 : index
    %c0_36 = arith.constant 0 : index
    %c0_37 = arith.constant 0 : index
    %57 = vector.load %arg14[%c0_35, %c0_36, %c0_37] : memref<2x16x1024xbf16, #tpu.memory_space<vmem>>, vector<2x16x1024xbf16>
    tpu.vector_store %arg14[%c0_35, %c0_36, %c0_37], %56 {strides = array<i32>} : memref<2x16x1024xbf16, #tpu.memory_space<vmem>>, vector<2x16x1024xbf16>,
    return
  }
  func.func @transform_0(%arg0: i32) -> (i32, i32) {
    %c0_i32 = arith.constant 0 : i32
    %c0_i32_0 = arith.constant 0 : i32
    return %arg0, %c0_i32 : i32, i32
  }
  func.func @transform_1(%arg0: i32) -> (i32, i32, i32) {
    %c0_i32 = arith.constant 0 : i32
    %c0_i32_0 = arith.constant 0 : i32
    %c0_i32_1 = arith.constant 0 : i32
    return %c0_i32, %arg0, %c0_i32_0 : i32, i32, i32
  }
  func.func @transform_2(%arg0: i32) -> (i32, i32) {
    %c0_i32 = arith.constant 0 : i32
    %c0_i32_0 = arith.constant 0 : i32
    %c0_i32_1 = arith.constant 0 : i32
    return %c0_i32, %c0_i32_0 : i32, i32
  }
  func.func @transform_3(%arg0: i32) -> (i32, i32) {
    %c0_i32 = arith.constant 0 : i32
    %c0_i32_0 = arith.constant 0 : i32
    %c0_i32_1 = arith.constant 0 : i32
    return %c0_i32, %c0_i32_0 : i32, i32
  }
  func.func @transform_4(%arg0: i32) -> (i32, i32) {
    %c0_i32 = arith.constant 0 : i32
    %c0_i32_0 = arith.constant 0 : i32
    %c0_i32_1 = arith.constant 0 : i32
    return %c0_i32, %c0_i32_0 : i32, i32
  }
  func.func @transform_5(%arg0: i32) -> (i32, i32) {
    %c0_i32 = arith.constant 0 : i32
    %c0_i32_0 = arith.constant 0 : i32
    %c0_i32_1 = arith.constant 0 : i32
    return %c0_i32, %c0_i32_0 : i32, i32
  }
  func.func @transform_6(%arg0: i32) -> (i32, i32) {
    %c0_i32 = arith.constant 0 : i32
    %c0_i32_0 = arith.constant 0 : i32
    %c0_i32_1 = arith.constant 0 : i32
    return %c0_i32, %c0_i32_0 : i32, i32
  }
  func.func @transform_7(%arg0: i32) -> (i32, i32) {
    %c0_i32 = arith.constant 0 : i32
    %c0_i32_0 = arith.constant 0 : i32
    %c0_i32_1 = arith.constant 0 : i32
    return %c0_i32, %c0_i32_0 : i32, i32
  }
  func.func @transform_8(%arg0: i32) -> (i32, i32) {
    %c0_i32 = arith.constant 0 : i32
    %c0_i32_0 = arith.constant 0 : i32
    %c0_i32_1 = arith.constant 0 : i32
    return %c0_i32, %c0_i32_0 : i32, i32
  }
  func.func @transform_9(%arg0: i32) -> (i32, i32) {
    %c0_i32 = arith.constant 0 : i32
    %c0_i32_0 = arith.constant 0 : i32
    %c0_i32_1 = arith.constant 0 : i32
    return %c0_i32, %c0_i32_0 : i32, i32
  }
  func.func @transform_10(%arg0: i32) -> (i32, i32) {
    %c0_i32 = arith.constant 0 : i32
    %c0_i32_0 = arith.constant 0 : i32
    return %arg0, %c0_i32 : i32, i32
  }
  func.func @transform_11(%arg0: i32) -> (i32, i32) {
    %c0_i32 = arith.constant 0 : i32
    %c0_i32_0 = arith.constant 0 : i32
    return %arg0, %c0_i32 : i32, i32
  }
  func.func @transform_12(%arg0: i32) -> (i32, i32, i32) {
    %c0_i32 = arith.constant 0 : i32
    %c0_i32_0 = arith.constant 0 : i32
    %c0_i32_1 = arith.constant 0 : i32
    return %c0_i32, %arg0, %c0_i32_0 : i32, i32, i32
  }
  func.func @transform_13(%arg0: i32) -> (i32, i32, i32) {
    %c0_i32 = arith.constant 0 : i32
    %c0_i32_0 = arith.constant 0 : i32
    %c0_i32_1 = arith.constant 0 : i32
    return %c0_i32, %arg0, %c0_i32_0 : i32, i32, i32
  }
}

</mosaic_0001>

<bundles_post_ra>
// kernel: vae_forward.1
= control target key start
LH: loop header
LB: loop body
LE: loop exit
PB: predicated region body
PF: predicated region fallthrough
CT: control target
= control target key end

     0   :  { %19 = vsyncpa [#allocation3], 0  ;;  %s3101_s0 = inlined_call_operand.vmem [shape: f32[16,1024], index: 0, kind: input, shape index: {}]   ;;  %s3102_s1 = inlined_call_operand.vmem [shape: f32[2,16,32], index: 1, kind: input, shape index: {}]   ;;  %s3103_s2 = inlined_call_operand.hbm [shape: bf16[1024,128], index: 2, kind: input, shape index: {}]   ;;  %s3104_s3 = inlined_call_operand.vmem [shape: f32[1,128], index: 3, kind: input, shape index: {}]   ;;  %s3105_s4 = inlined_call_operand.vmem [shape: bf16[128,256], index: 4, kind: input, shape index: {}]   ;;  %s3106_s5 = inlined_call_operand.vmem [shape: f32[1,256], index: 5, kind: input, shape index: {}]   ;;  %s3107_s6 = inlined_call_operand.vmem [shape: bf16[128,128], index: 6, kind: input, shape index: {}]   ;;  %s3108_s7 = inlined_call_operand.vmem [shape: f32[1,128], index: 7, kind: input, shape index: {}]   ;;  %s3109_s8 = inlined_call_operand.hbm [shape: bf16[128,1024], index: 8, kind: input, shape index: {}]   ;;  %s3110_s9 = inlined_call_operand.vmem [shape: f32[1,1024], index: 9, kind: input, shape index: {}]   ;;  %s3111_s10 = inlined_call_operand.vmem [shape: bf16[16,128], index: 10, kind: output, shape index: {0}]   ;;  %s3112_s11 = inlined_call_operand.vmem [shape: bf16[16,128], index: 11, kind: output, shape index: {1}]   ;;  %s3113_s12 = inlined_call_operand.vmem [shape: bf16[2,16,128], index: 12, kind: output, shape index: {2}]   ;;  %s3114_s13 = inlined_call_operand.vmem [shape: bf16[2,16,1024], index: 13, kind: output, shape index: {3}]  }
   0x1   :  { %20 = vsyncpa [#allocation5], 0  ;;  %s2730_s25 = smov [#allocation2]  }
   0x2   :  { %s30_s26 = sshll.u32 %s2730_s25, 4  ;;  %s31_s26 = int_to_ptr.vmem [resolvable:$true] %s30_s26 }
   0x3   :  { %s2694_s27 = scalar_lea.vmem %s31_s26, 8192  ;;  %p2699_p1 = scmp.lt.s32.totalorder %s31_s26, %s31_s26 }
   0x4   :  { %p2695_p0 = scmp.ne.s32.totalorder %s31_s26, %s2694_s27  ;;  %p2700_p2 = scmp.lt.s32.totalorder %s2694_s27, %s2694_s27 }
   0x6   :  { %p2701_p3 = por %p2700_p2, %p2699_p1 }
   0x8   :  { %p2702_p4 = pnand %p2701_p3, %p2695_p0 }
   0xa   :  { %2705 = shalt.err (!%p2702_p4)
}
   0xb   :  { %s2731_s28 = smov 64   ;;  %s2732_s29 = smov 4  }
   0xc   :  { %36 = dma.hbm_to_vmem [thread:$0]  %s3103_s2, 8192, %s31_s26, [#allocation3], %s2731_s28, %s2731_s28, %s2732_s29  }
   0xd   :  { %s2733_s15 = smov [#allocation4]  }
   0xe   :  { %s52_s16 = sshll.u32 %s2733_s15, 4  ;;  %s53_s16 = int_to_ptr.vmem [resolvable:$true] %s52_s16 }
   0xf   :  { %s2714_s17 = scalar_lea.vmem %s53_s16, 8192  ;;  %p2719_p6 = scmp.lt.s32.totalorder %s53_s16, %s53_s16 }
  0x10   :  { %p2715_p5 = scmp.ne.s32.totalorder %s53_s16, %s2714_s17  ;;  %p2720_p7 = scmp.lt.s32.totalorder %s2714_s17, %s2714_s17 }
  0x12   :  { %p2721_p8 = por %p2720_p7, %p2719_p6 }
  0x14   :  { %p2722_p9 = pnand %p2721_p8, %p2715_p5 }
  0x16   :  { %2725 = shalt.err (!%p2722_p9)
}
  0x17   :  { %s2734_s18 = smov 512   ;;  %s2735_s19 = smov 32  }
  0x18   :  { %58 = dma.hbm_to_vmem [thread:$0]  %s3109_s8, 8192, %s53_s16, [#allocation5], %s2734_s18, %s2734_s18, %s2735_s19  }
  0x19   :  { %2726 = dma.done.wait [#allocation3], 8192  }
  0x1a   :  { %2727 = vsyncadd [#allocation3], 4294959104 }
  0x1b   :  { %2728 = dma.done.wait [#allocation5], 8192  }
  0x1c   :  { %2729 = vsyncadd [#allocation5], 4294959104  ;;  %v2458_v0 = vld [vmem:[#allocation2 + $0x78] sm:$0xff]   ;;  %v2462_v4 = vld [vmem:[#allocation2 + $0x70] sm:$0xff]   ;;  %vm959_vm0 = vcmask 261120  }
  0x1d   :  { %v2459_v1 = vld [vmem:[#allocation2 + $0xf8] sm:$0xff]   ;;  %2333 = vmatprep.subr.bf16.mxu0 %v2458_v0  ;;  %v2463_v5 = vld [vmem:[#allocation2 + $0xf0] sm:$0xff]   ;;  %v2466_v8 = vld [vmem:[#allocation2 + $0x68] sm:$0xff]  }
  0x1e   :  { %v2460_v2 = vld [vmem:[#allocation2 + $0x38] sm:$0xff]   ;;  %2355 = vmatprep.subr.bf16.mxu1 %v2459_v1  ;;  %v2464_v6 = vld [vmem:[#allocation2 + $0x30] sm:$0xff]   ;;  %v2467_v9 = vld [vmem:[#allocation2 + $0xe8] sm:$0xff]  }
  0x1f   :  { %v2461_v3 = vld [vmem:[#allocation2 + $0xb8] sm:$0xff]   ;;  %2334 = vmatpush3.bf16.msra.mxu0 %v2460_v2  ;;  %v2465_v7 = vld [vmem:[#allocation2 + $0xb0] sm:$0xff]   ;;  %v2468_v10 = vld [vmem:[#allocation2 + $0x28] sm:$0xff]  }
  0x20   :  { %2356 = vmatpush3.bf16.msra.mxu1 %v2461_v3  ;;  %2335 = vmatprep.subr.bf16.mxu0 %v2462_v4  ;;  %v2469_v11 = vld [vmem:[#allocation2 + $0xa8] sm:$0xff]   ;;  %v2470_v12 = vld [vmem:[#allocation2 + $0x60] sm:$0xff]   ;;  %v2474_v16 = vld [vmem:[#allocation2 + $0x58] sm:$0xff]  }
  0x21   :  { %2357 = vmatprep.subr.bf16.mxu1 %v2463_v5  ;;  %v2471_v13 = vld [vmem:[#allocation2 + $0xe0] sm:$0xff]   ;;  %v2475_v17 = vld [vmem:[#allocation2 + $0xd8] sm:$0xff]   ;;  %v2478_v20 = vld [vmem:[#allocation2 + $0x50] sm:$0xff]  }
  0x22   :  { %v2472_v14 = vld [vmem:[#allocation2 + $0x20] sm:$0xff]   ;;  %v2476_v18 = vld [vmem:[#allocation2 + $0x18] sm:$0xff]   ;;  %v2479_v21 = vld [vmem:[#allocation2 + $0xd0] sm:$0xff]  }
  0x23   :  { %2336 = vmatpush3.bf16.msra.mxu0 %v2464_v6  ;;  %v2473_v15 = vld [vmem:[#allocation2 + $0xa0] sm:$0xff]   ;;  %v2477_v19 = vld [vmem:[#allocation2 + $0x98] sm:$0xff]   ;;  %v2480_v22 = vld [vmem:[#allocation2 + $0x10] sm:$0xff]  }
  0x24   :  { %2358 = vmatpush3.bf16.msra.mxu1 %v2465_v7  ;;  %2337 = vmatprep.subr.bf16.mxu0 %v2466_v8  ;;  %v2481_v23 = vld [vmem:[#allocation2 + $0x90] sm:$0xff]   ;;  %v2482_v24 = vld [vmem:[#allocation2 + $0x48] sm:$0xff]   ;;  %v2486_v28 = vld [vmem:[#allocation2 + $0x40] sm:$0xff]  }
  0x25   :  { %2359 = vmatprep.subr.bf16.mxu1 %v2467_v9  ;;  %v2483_v25 = vld [vmem:[#allocation2 + $0xc8] sm:$0xff]   ;;  %v2487_v29 = vld [vmem:[#allocation2 + $0xc0] sm:$0xff]   ;;  %v71_v34 = vld [vmem:[%s3101_s0 + $0x18] sm:$0xff] }
  0x26   :  { %v2484_v26 = vld [vmem:[#allocation2 + $0x8] sm:$0xff]   ;;  %v2488_v30 = vld [vmem:[#allocation2] sm:$0xff]   ;;  %v79_v36 = vld [vmem:[%s3101_s0 + $0x58] sm:$0xff] }
  0x27   :  { %2338 = vmatpush3.bf16.msra.mxu0 %v2468_v10  ;;  %v2485_v27 = vld [vmem:[#allocation2 + $0x88] sm:$0xff]   ;;  %v2489_v31 = vld [vmem:[#allocation2 + $0x80] sm:$0xff]   ;;  %v87_v39 = vpack.c.bf16 %v79_v36, %v71_v34  ;;  %v70_v41 = vld [vmem:[%s3101_s0 + $0x10] sm:$0xff] }
  0x28   :  { %2360 = vmatpush3.bf16.msra.mxu1 %v2469_v11  ;;  %2339 = vmatprep.subr.bf16.mxu0 %v2470_v12  ;;  %v69_v32 = vld [vmem:[%s3101_s0 + $0x8] sm:$0xff]  ;;  %v68_v37 = vld [vmem:[%s3101_s0] sm:$0xff]  ;;  %v78_v42 = vld [vmem:[%s3101_s0 + $0x50] sm:$0xff] }
  0x29   :  { %2361 = vmatprep.subr.bf16.mxu1 %v2471_v13  ;;  %v77_v33 = vld [vmem:[%s3101_s0 + $0x48] sm:$0xff]  ;;  %v76_v38 = vld [vmem:[%s3101_s0 + $0x40] sm:$0xff]  ;;  %v86_v43 = vpack.c.bf16 %v78_v42, %v70_v41  ;;  %v2490_v44 = vld [vmem:[#allocation2 + $0x178] sm:$0xff]   ;;  %684 = vmatprep.mubr.bf16.mxu1 %v87_v39 }
  0x2a   :  { %v85_v35 = vpack.c.bf16 %v77_v33, %v69_v32  ;;  %v84_v40 = vpack.c.bf16 %v76_v38, %v68_v37  ;;  %v2491_v45 = vld [vmem:[#allocation2 + $0x1f8] sm:$0xff]   ;;  %v2494_v48 = vld [vmem:[#allocation2 + $0x170] sm:$0xff]   ;;  %v2498_v52 = vld [vmem:[#allocation2 + $0x168] sm:$0xff]  }
  0x2b   :  { %2340 = vmatpush3.bf16.msra.mxu0 %v2472_v14  ;;  %v2492_v46 = vld [vmem:[#allocation2 + $0x138] sm:$0xff]   ;;  %v2495_v49 = vld [vmem:[#allocation2 + $0x1f0] sm:$0xff]   ;;  %v2499_v53 = vld [vmem:[#allocation2 + $0x1e8] sm:$0xff]  }
  0x2c   :  { %2362 = vmatpush3.bf16.msra.mxu1 %v2473_v15  ;;  %2341 = vmatprep.subr.bf16.mxu0 %v2474_v16  ;;  %v2493_v47 = vld [vmem:[#allocation2 + $0x1b8] sm:$0xff]   ;;  %v2496_v50 = vld [vmem:[#allocation2 + $0x130] sm:$0xff]   ;;  %v2500_v54 = vld [vmem:[#allocation2 + $0x128] sm:$0xff]  }
  0x2d   :  { %2363 = vmatprep.subr.bf16.mxu1 %v2475_v17  ;;  %643 = vmatprep.mubr.bf16.mxu0 %v85_v35  ;;  %v2497_v51 = vld [vmem:[#allocation2 + $0x1b0] sm:$0xff]   ;;  %v2501_v55 = vld [vmem:[#allocation2 + $0x1a8] sm:$0xff]   ;;  %v2502_v56 = vld [vmem:[#allocation2 + $0x160] sm:$0xff]  }
  0x2e   :  { %v2503_v57 = vld [vmem:[#allocation2 + $0x1e0] sm:$0xff]   ;;  %v2506_v60 = vld [vmem:[#allocation2 + $0x158] sm:$0xff]   ;;  %v2510_v0 = vld [vmem:[#allocation2 + $0x150] sm:$0xff]  }
  0x2f   :  { %2342 = vmatpush3.bf16.msra.mxu0 %v2476_v18  ;;  %v2504_v58 = vld [vmem:[#allocation2 + $0x120] sm:$0xff]   ;;  %v2507_v61 = vld [vmem:[#allocation2 + $0x1d8] sm:$0xff]   ;;  %v2511_v1 = vld [vmem:[#allocation2 + $0x1d0] sm:$0xff]  }
  0x30   :  { %2364 = vmatpush3.bf16.msra.mxu1 %v2477_v19  ;;  %2343 = vmatprep.subr.bf16.mxu0 %v2478_v20  ;;  %v2505_v59 = vld [vmem:[#allocation2 + $0x1a0] sm:$0xff]   ;;  %v2508_v62 = vld [vmem:[#allocation2 + $0x118] sm:$0xff]   ;;  %v2512_v2 = vld [vmem:[#allocation2 + $0x110] sm:$0xff]  }
  0x31   :  { %2365 = vmatprep.subr.bf16.mxu1 %v2479_v21  ;;  %v2509_v63 = vld [vmem:[#allocation2 + $0x198] sm:$0xff]   ;;  %v2513_v3 = vld [vmem:[#allocation2 + $0x190] sm:$0xff]   ;;  %v2514_v4 = vld [vmem:[#allocation2 + $0x148] sm:$0xff]  }
  0x32   :  { %v2515_v5 = vld [vmem:[#allocation2 + $0x1c8] sm:$0xff]   ;;  %v2518_v8 = vld [vmem:[#allocation2 + $0x140] sm:$0xff]   ;;  %v75_v14 = vld [vmem:[%s3101_s0 + $0x38] sm:$0xff] }
  0x33   :  { %2344 = vmatpush3.bf16.msra.mxu0 %v2480_v22  ;;  %v2516_v6 = vld [vmem:[#allocation2 + $0x108] sm:$0xff]   ;;  %v2519_v9 = vld [vmem:[#allocation2 + $0x1c0] sm:$0xff]   ;;  %v83_v15 = vld [vmem:[%s3101_s0 + $0x78] sm:$0xff] }
  0x34   :  { %2366 = vmatpush3.bf16.msra.mxu1 %v2481_v23  ;;  %2345 = vmatprep.subr.bf16.mxu0 %v2482_v24  ;;  %v2517_v7 = vld [vmem:[#allocation2 + $0x188] sm:$0xff]   ;;  %v2520_v10 = vld [vmem:[#allocation2 + $0x100] sm:$0xff]   ;;  %v91_v17 = vpack.c.bf16 %v83_v15, %v75_v14  ;;  %v74_v20 = vld [vmem:[%s3101_s0 + $0x30] sm:$0xff] }
  0x35   :  { %2367 = vmatprep.subr.bf16.mxu1 %v2483_v25  ;;  %v2521_v11 = vld [vmem:[#allocation2 + $0x180] sm:$0xff]   ;;  %v73_v12 = vld [vmem:[%s3101_s0 + $0x28] sm:$0xff]  ;;  %v82_v22 = vld [vmem:[%s3101_s0 + $0x70] sm:$0xff] }
  0x36   :  { %v81_v13 = vld [vmem:[%s3101_s0 + $0x68] sm:$0xff]  ;;  %v72_v18 = vld [vmem:[%s3101_s0 + $0x20] sm:$0xff]  ;;  %v90_v23 = vpack.c.bf16 %v82_v22, %v74_v20  ;;  %v2522_v24 = vld [vmem:[%s3105_s4 + $0x70] ss:$8 sps:$4 sm:$0xff]  }
  0x37   :  { %2346 = vmatpush3.bf16.msra.mxu0 %v2484_v26  ;;  %v89_v16 = vpack.c.bf16 %v81_v13, %v73_v12  ;;  %v80_v19 = vld [vmem:[%s3101_s0 + $0x60] sm:$0xff]  ;;  %v2524_v25 = vld [vmem:[%s3105_s4 + $0x74] ss:$8 sps:$4 sm:$0xff]   ;;  %v2534_v33 = vld [vmem:[%s3105_s4 + $0x30] ss:$8 sps:$4 sm:$0xff]  }
  0x38   :  { %2368 = vmatpush3.bf16.msra.mxu1 %v2485_v27  ;;  %2347 = vmatprep.subr.bf16.mxu0 %v2486_v28  ;;  %v88_v21 = vpack.c.bf16 %v80_v19, %v72_v18  ;;  %v2527_v26 = vld [vmem:[%s3105_s4 + $0x64] ss:$8 sps:$4 sm:$0xff]   ;;  %v2525_v27 = vld [vmem:[%s3105_s4 + $0x60] ss:$8 sps:$4 sm:$0xff]   ;;  %v2530_v28 = vld [vmem:[%s3105_s4 + $0x54] ss:$8 sps:$4 sm:$0xff]  }
  0x39   :  { %2369 = vmatprep.subr.bf16.mxu1 %v2487_v29  ;;  %v2528_v29 = vld [vmem:[%s3105_s4 + $0x50] ss:$8 sps:$4 sm:$0xff]   ;;  %v2536_v32 = vld [vmem:[%s3105_s4 + $0x34] ss:$8 sps:$4 sm:$0xff]   ;;  %v2539_v34 = vld [vmem:[%s3105_s4 + $0x24] ss:$8 sps:$4 sm:$0xff]  }
  0x3a   :  { %v2537_v35 = vld [vmem:[%s3105_s4 + $0x20] ss:$8 sps:$4 sm:$0xff]   ;;  %v2542_v36 = vld [vmem:[%s3105_s4 + $0x14] ss:$8 sps:$4 sm:$0xff]   ;;  %v2540_v37 = vld [vmem:[%s3105_s4 + $0x10] ss:$8 sps:$4 sm:$0xff]  }
  0x3b   :  { %2348 = vmatpush3.bf16.msra.mxu0 %v2488_v30  ;;  %v2533_v30 = vld [vmem:[%s3105_s4 + $0x44] ss:$8 sps:$4 sm:$0xff]   ;;  %v2543_v39 = vld [vmem:[%s3105_s4] ss:$8 sps:$4 sm:$0xff]   ;;  %v2546_v13 = vld [vmem:[%s3107_s6 + $0x38] sm:$0xff]  }
  0x3c   :  { %2370 = vmatpush3.bf16.msra.mxu1 %v2489_v31  ;;  %2377 = vmatprep.subr.bf16.mxu0 %v2490_v44  ;;  %v2531_v31 = vld [vmem:[%s3105_s4 + $0x40] ss:$8 sps:$4 sm:$0xff]   ;;  %v2545_v38 = vld [vmem:[%s3105_s4 + $0x4] ss:$8 sps:$4 sm:$0xff]   ;;  %v2547_v14 = vld [vmem:[%s3107_s6 + $0x30] sm:$0xff]  }
  0x3d   :  { %2399 = vmatprep.subr.bf16.mxu1 %v2491_v45  ;;  %v2548_v15 = vld [vmem:[%s3107_s6 + $0x28] sm:$0xff]   ;;  %v2551_v18 = vld [vmem:[%s3107_s6 + $0x10] sm:$0xff]   ;;  %v2553_v20 = vld [vmem:[%s3107_s6] sm:$0xff]  }
  0x3e   :  { %644 = vmatmul.mubr.bf16.vlgmr.msra.gmra.mxu0 %v84_v40  ;;  %v2736_v40 = vmov 0   ;;  %v2552_v19 = vld [vmem:[%s3107_s6 + $0x8] sm:$0xff]   ;;  %v1178_v22 = vld [vmem:[#allocation4 + $0x1e0] sm:$0xff] }
  0x3f   :  { %685 = vmatmul.mubr.bf16.vlgmr.msra.gmra.mxu1 %v86_v43  ;;  %2378 = vmatpush3.bf16.msra.mxu0 %v2492_v46 }
  0x40   :  { %2400 = vmatpush3.bf16.msra.mxu1 %v2493_v47  ;;  %2379 = vmatprep.subr.bf16.mxu0 %v2494_v48  ;;  %v2078_v48 = vld [vmem:[%s3104_s3] ss:$0 sm:$0xff] }
  0x41   :  { %2401 = vmatprep.subr.bf16.mxu1 %v2495_v49  ;;  %725 = vmatprep.mubr.bf16.mxu0 %v89_v16  ;;  %v2549_v16 = vld [vmem:[%s3107_s6 + $0x20] sm:$0xff]  }
  0x42   :  { %766 = vmatprep.mubr.bf16.mxu1 %v91_v17  ;;  %v2550_v17 = vld [vmem:[%s3107_s6 + $0x18] sm:$0xff]  }
  0x43   :  { %2380 = vmatpush3.bf16.msra.mxu0 %v2496_v50 }
  0x44   :  { %2402 = vmatpush3.bf16.msra.mxu1 %v2497_v51  ;;  %2381 = vmatprep.subr.bf16.mxu0 %v2498_v52 }
  0x45   :  { %2403 = vmatprep.subr.bf16.mxu1 %v2499_v53 }
  0x47   :  { %2382 = vmatpush3.bf16.msra.mxu0 %v2500_v54 }
  0x48   :  { %2404 = vmatpush3.bf16.msra.mxu1 %v2501_v55  ;;  %2383 = vmatprep.subr.bf16.mxu0 %v2502_v56 }
  0x49   :  { %2405 = vmatprep.subr.bf16.mxu1 %v2503_v57 }
  0x4b   :  { %2384 = vmatpush3.bf16.msra.mxu0 %v2504_v58 }
  0x4c   :  { %2406 = vmatpush3.bf16.msra.mxu1 %v2505_v59  ;;  %2385 = vmatprep.subr.bf16.mxu0 %v2506_v60 }
  0x4d   :  { %2407 = vmatprep.subr.bf16.mxu1 %v2507_v61 }
  0x4f   :  { %2386 = vmatpush3.bf16.msra.mxu0 %v2508_v62 }
  0x50   :  { %2408 = vmatpush3.bf16.msra.mxu1 %v2509_v63  ;;  %2387 = vmatprep.subr.bf16.mxu0 %v2510_v0 }
  0x51   :  { %2409 = vmatprep.subr.bf16.mxu1 %v2511_v1 }
  0x53   :  { %2388 = vmatpush3.bf16.msra.mxu0 %v2512_v2 }
  0x54   :  { %2410 = vmatpush3.bf16.msra.mxu1 %v2513_v3  ;;  %2389 = vmatprep.subr.bf16.mxu0 %v2514_v4 }
  0x55   :  { %2411 = vmatprep.subr.bf16.mxu1 %v2515_v5 }
  0x57   :  { %2390 = vmatpush3.bf16.msra.mxu0 %v2516_v6 }
  0x58   :  { %2412 = vmatpush3.bf16.msra.mxu1 %v2517_v7  ;;  %2391 = vmatprep.subr.bf16.mxu0 %v2518_v8 }
  0x59   :  { %2413 = vmatprep.subr.bf16.mxu1 %v2519_v9 }
  0x5b   :  { %2392 = vmatpush3.bf16.msra.mxu0 %v2520_v10 }
  0x5c   :  { %2414 = vmatpush3.bf16.msra.mxu1 %v2521_v11  ;;  %886 = vmatprep.subr.bf16.mxu0 %v2524_v25 }
  0x5d   :  { %2431 = vmatprep.subr.bf16.mxu1 %v2546_v13 }
  0x5e   :  { %726 = vmatmul.mubr.bf16.vlgmr.msra.gmra.mxu0 %v88_v21  ;;  %v1174_v21 = vld [vmem:[#allocation4 + $0x1c0] sm:$0xff] }
  0x5f   :  { %767 = vmatmul.mubr.bf16.vlgmr.msra.gmra.mxu1 %v90_v23  ;;  %887 = vmatpush1.bf16.msra.mxu0 %v2522_v24  ;;  %v2938_v23 = vld [vmem:[#allocation4 + $0x1c8] sm:$0xff]  ;;  %v2232_v24 = vcombine.low %v1174_v21, %v1178_v22  ;;  %v2233_v25 = vcombine.high %v1174_v21, %v1178_v22 }
  0x60   :  { %888 = vmatprep.subr.bf16.mxu0 %v2527_v26  ;;  %918 = vmatprep.mubr.bf16.mxu0 %v2736_v40  ;;  %v2940_v26 = vld [vmem:[#allocation4 + $0x1e8] sm:$0xff] }
  0x61   :  { %2432 = vmatpush3.bf16.msra.mxu1 %v2546_v13  ;;  %v1167_v21 = vld [vmem:[#allocation4 + $0x188] sm:$0xff] }
  0x62   :  { %2433 = vmatprep.subr.bf16.mxu1 %v2547_v14  ;;  %v1171_v22 = vld [vmem:[#allocation4 + $0x1a8] sm:$0xff] }
  0x63   :  { %889 = vmatpush1.bf16.msra.mxu0 %v2525_v27  ;;  %v1166_v27 = vld [vmem:[#allocation4 + $0x180] sm:$0xff] }
  0x64   :  { %890 = vmatprep.subr.bf16.mxu0 %v2530_v28  ;;  %v1170_v28 = vld [vmem:[#allocation4 + $0x1a0] sm:$0xff] }
  0x65   :  { %2434 = vmatpush3.bf16.msra.mxu1 %v2547_v14 }
  0x66   :  { %2435 = vmatprep.subr.bf16.mxu1 %v2548_v15 }
  0x67   :  { %891 = vmatpush1.bf16.msra.mxu0 %v2528_v29  ;;  %v2234_v29 = vcombine.low %v2938_v23, %v2940_v26 }
  0x68   :  { %892 = vmatprep.subr.bf16.mxu0 %v2533_v30  ;;  %v2235_v30 = vcombine.high %v2938_v23, %v2940_v26  ;;  %v1134_v26 = vld [vmem:[#allocation4 + $0x80] sm:$0xff] }
  0x69   :  { %2436 = vmatpush3.bf16.msra.mxu1 %v2548_v15 }
  0x6a   :  { %2437 = vmatprep.subr.bf16.mxu1 %v2549_v16 }
  0x6b   :  { %893 = vmatpush1.bf16.msra.mxu0 %v2531_v31  ;;  %v2225_v31 = vcombine.high %v1166_v27, %v1170_v28 }
  0x6c   :  { %894 = vmatprep.subr.bf16.mxu0 %v2536_v32  ;;  %v2224_v32 = vcombine.low %v1166_v27, %v1170_v28  ;;  %v2227_v27 = vcombine.high %v1167_v21, %v1171_v22  ;;  %v1159_v28 = vld [vmem:[#allocation4 + $0x148] sm:$0xff] }
  0x6d   :  { %2438 = vmatpush3.bf16.msra.mxu1 %v2549_v16 }
  0x6e   :  { %2439 = vmatprep.subr.bf16.mxu1 %v2550_v17 }
  0x6f   :  { %895 = vmatpush1.bf16.msra.mxu0 %v2534_v33  ;;  %v1158_v33 = vld [vmem:[#allocation4 + $0x140] sm:$0xff] }
  0x70   :  { %896 = vmatprep.subr.bf16.mxu0 %v2539_v34  ;;  %v1162_v34 = vld [vmem:[#allocation4 + $0x160] sm:$0xff] }
  0x71   :  { %2440 = vmatpush3.bf16.msra.mxu1 %v2550_v17 }
  0x72   :  { %2441 = vmatprep.subr.bf16.mxu1 %v2551_v18 }
  0x73   :  { %897 = vmatpush1.bf16.msra.mxu0 %v2537_v35  ;;  %v2217_v35 = vcombine.high %v1158_v33, %v1162_v34 }
  0x74   :  { %898 = vmatprep.subr.bf16.mxu0 %v2542_v36  ;;  %v2216_v36 = vcombine.low %v1158_v33, %v1162_v34  ;;  %v1151_v33 = vld [vmem:[#allocation4 + $0x108] sm:$0xff] }
  0x75   :  { %2442 = vmatpush3.bf16.msra.mxu1 %v2551_v18  ;;  %v1155_v34 = vld [vmem:[#allocation4 + $0x128] sm:$0xff] }
  0x76   :  { %2443 = vmatprep.subr.bf16.mxu1 %v2552_v19 }
  0x77   :  { %899 = vmatpush1.bf16.msra.mxu0 %v2540_v37  ;;  %v1150_v37 = vld [vmem:[#allocation4 + $0x100] sm:$0xff] }
  0x78   :  { %900 = vmatprep.subr.bf16.mxu0 %v2545_v38  ;;  %v1154_v38 = vld [vmem:[#allocation4 + $0x120] sm:$0xff] }
  0x79   :  { %2444 = vmatpush3.bf16.msra.mxu1 %v2552_v19 }
  0x7a   :  { %2445 = vmatprep.subr.bf16.mxu1 %v2553_v20 }
  0x7b   :  { %901 = vmatpush1.bf16.msra.mxu0 %v2543_v39  ;;  %v2209_v39 = vcombine.high %v1150_v37, %v1154_v38 }
  0x7c   :  { %1544 = vmatprep.subr.bf16.mxu0 %v2233_v25 }
  0x7d   :  { %2446 = vmatpush3.bf16.msra.mxu1 %v2553_v20 }
  0x7e   :  { %1597 = vmatprep.subr.bf16.mxu1 %v2235_v30  ;;  %v1163_v30 = vld [vmem:[#allocation4 + $0x168] sm:$0xff] }
  0xfe   :  { %v2349_v41 = vpop.f32.mrf.mxu0 }
  0xff   :  { %v2371_v42 = vpop.f32.mrf.mxu1 }
 0x100   :  { %v2350_v43 = vpop.f32.mrf.mxu0 }
 0x101   :  { %v2372_v44 = vpop.f32.mrf.mxu1  ;;  %v2351_v46 = vadd.f32 %v2350_v43, %v2349_v41  ;;  %v2208_v41 = vcombine.low %v1150_v37, %v1154_v38  ;;  %v1146_v43 = vld [vmem:[#allocation4 + $0xe0] sm:$0xff]  ;;  %v1143_v37 = vld [vmem:[#allocation4 + $0xc8] sm:$0xff] }
 0x102   :  { %v2352_v45 = vpop.f32.mrf.mxu0  ;;  %v2373_v51 = vadd.f32 %v2372_v44, %v2371_v42  ;;  %v1142_v42 = vld [vmem:[#allocation4 + $0xc0] sm:$0xff]  ;;  %v1147_v38 = vld [vmem:[#allocation4 + $0xe8] sm:$0xff] }
 0x103   :  { %v2374_v47 = vpop.f32.mrf.mxu1  ;;  %v646_v50 = vadd.f32 %v2351_v46, %v2078_v48  ;;  %v2201_v44 = vcombine.high %v1142_v42, %v1146_v43  ;;  %v796_v46 = vlaneseq  ;;  %v2202_v23 = vcombine.low %v1143_v37, %v1147_v38 }
 0x104   :  { %v2353_v49 = vpop.f32.mrf.mxu0 }
 0x105   :  { %v2354_v52 = vadd.f32 %v2353_v49, %v2352_v45  ;;  %v2375_v53 = vpop.f32.mrf.mxu1  ;;  %v687_v57 = vadd.f32 %v2373_v51, %v646_v50  ;;  %v2200_v45 = vcombine.low %v1142_v42, %v1146_v43  ;;  %v794_v50 = vld [vmem:[%s3106_s5] sm:$0x3]  ;;  %v1135_v42 = vld [vmem:[#allocation4 + $0x88] sm:$0xff] }
 0x106   :  { %v2376_v62 = vadd.f32 %v2375_v53, %v2374_v47  ;;  %v2946_v47 = vshrl.u32 %v796_v46, 7 }
 0x107   :  { %v649_v58 = vadd.f32 %v2354_v52, %v2078_v48 }
 0x108   :  { %v802_v48 = vsub.s32 1, %v2946_v47  ;;  %v798_v49 = vsub.s32 0, %v2946_v47 }
 0x109   :  { %v690_v2 = vadd.f32 %v2376_v62, %v649_v58 }
 0x10a   :  { %v803_v51 = vrot.slane %v794_v50, %v802_v48  ;;  %v799_v53 = vrot.slane %v794_v50, %v798_v49 }
 0x11e   :  { %v2393_v54 = vpop.f32.mrf.mxu0 }
 0x11f   :  { %v2415_v55 = vpop.f32.mrf.mxu1 }
 0x120   :  { %v2394_v56 = vpop.f32.mrf.mxu0 }
 0x121   :  { %v2395_v59 = vadd.f32 %v2394_v56, %v2393_v54  ;;  %v2416_v60 = vpop.f32.mrf.mxu1 }
 0x122   :  { %v2396_v61 = vpop.f32.mrf.mxu0  ;;  %v2417_v3 = vadd.f32 %v2416_v60, %v2415_v55 }
 0x123   :  { %v728_v63 = vadd.f32 %v2395_v59, %v687_v57  ;;  %v2418_v0 = vpop.f32.mrf.mxu1 }
 0x124   :  { %v2397_v1 = vpop.f32.mrf.mxu0 }
 0x125   :  { %v2398_v4 = vadd.f32 %v2397_v1, %v2396_v61  ;;  %v2419_v5 = vpop.f32.mrf.mxu1  ;;  %v769_v6 = vadd.f32 %v2417_v3, %v728_v63  ;;  %v955_v3 = vld [vmem:[%s3102_s1] sm:$0xff] }
 0x126   :  { %v2420_v8 = vadd.f32 %v2419_v5, %v2418_v0  ;;  %v956_v5 = vld [vmem:[%s3102_s1 + $0x8] sm:$0xff] }
 0x127   :  { %v731_v7 = vadd.f32 %v2398_v4, %v690_v2  ;;  %v775_v10 = vmax.f32 %v769_v6, 0.0  ;;  %v957_v4 = vld [vmem:[%s3102_s1 + $0x10] sm:$0xff]  ;;  %v958_v6 = vld [vmem:[%s3102_s1 + $0x18] sm:$0xff] }
 0x129   :  { %v772_v9 = vadd.f32 %v2420_v8, %v731_v7  ;;  %v960_v8 = vsel %vm959_vm0, %v955_v3, 0.0  ;;  %v1176_v3 = vld [vmem:[#allocation4 + $0x1d0] sm:$0xff] }
 0x12b   :  { %v776_v11 = vmax.f32 %v772_v9, 0.0  ;;  %v962_v9 = vsel %vm959_vm0, %v957_v4, 0.0  ;;  %v1180_v4 = vld [vmem:[#allocation4 + $0x1f0] sm:$0xff] }
 0x12d   :  { %v777_v12 = vpack.c.bf16 %v776_v11, %v775_v10  ;;  %v961_v10 = vsel %vm959_vm0, %v956_v5, 0.0  ;;  %v963_v11 = vsel %vm959_vm0, %v958_v6, 0.0  ;;  %v1177_v5 = vld [vmem:[#allocation4 + $0x1d8] sm:$0xff]  ;;  %v2236_v6 = vcombine.low %v1176_v3, %v1180_v4 }
 0x12f   :  { %919 = vmatmul.mubr.bf16.vlgmr.msra.gmra.mxu0 %v777_v12 }
 0x130   :  { %1576 = vmatprep.mubr.bf16.mxu0 %v2736_v40  ;;  %1545 = vmatpush1.bf16.msra.mxu0 %v2232_v24 }
 0x131   :  { %1546 = vmatprep.subr.bf16.mxu0 %v2225_v31  ;;  %v2226_v31 = vcombine.low %v1167_v21, %v1171_v22  ;;  %v1173_v21 = vld [vmem:[#allocation4 + $0x1b8] sm:$0xff] }
 0x134   :  { %1547 = vmatpush1.bf16.msra.mxu0 %v2224_v32  ;;  %v2219_v32 = vcombine.high %v1159_v28, %v1163_v30 }
 0x135   :  { %1548 = vmatprep.subr.bf16.mxu0 %v2217_v35  ;;  %v2218_v35 = vcombine.low %v1159_v28, %v1163_v30 }
 0x138   :  { %1549 = vmatpush1.bf16.msra.mxu0 %v2216_v36  ;;  %v2211_v36 = vcombine.high %v1151_v33, %v1155_v34 }
 0x139   :  { %1550 = vmatprep.subr.bf16.mxu0 %v2209_v39  ;;  %v2210_v39 = vcombine.low %v1151_v33, %v1155_v34  ;;  %v1161_v33 = vld [vmem:[#allocation4 + $0x158] sm:$0xff] }
 0x13a   :  { %v1165_v34 = vld [vmem:[#allocation4 + $0x178] sm:$0xff] }
 0x13c   :  { %1551 = vmatpush1.bf16.msra.mxu0 %v2208_v41  ;;  %v2203_v41 = vcombine.high %v1143_v37, %v1147_v38 }
 0x13d   :  { %1552 = vmatprep.subr.bf16.mxu0 %v2201_v44  ;;  %v1139_v44 = vld [vmem:[#allocation4 + $0xa8] sm:$0xff] }
 0x13e   :  { %v2194_v46 = vcombine.low %v1135_v42, %v1139_v44  ;;  %v2195_v50 = vcombine.high %v1135_v42, %v1139_v44  ;;  %v1157_v42 = vld [vmem:[#allocation4 + $0x138] sm:$0xff] }
 0x140   :  { %1553 = vmatpush1.bf16.msra.mxu0 %v2200_v45 }
 0x1ef   :  { %v920_v52 = vpop.f32.mrf.mxu0 }
 0x1f0   :  { %v921_v57 = vadd.f32 %v920_v52, %v799_v53  ;;  %v1130_v52 = vld [vmem:[#allocation4 + $0x60] sm:$0xff] }
 0x1f1   :  { %v922_v54 = vpop.f32.mrf.mxu0 }
 0x1f2   :  { %v923_v55 = vadd.f32 %v922_v54, %v803_v51 }
 0x1f3   :  { %v924_v56 = vpop.f32.mrf.mxu0 }
 0x1f4   :  { %v929_v58 = vmul.f32 0.5, %v923_v55  ;;  %v925_v59 = vadd.f32 %v924_v56, %v799_v53  ;;  %v1127_v53 = vld [vmem:[#allocation4 + $0x48] sm:$0xff] }
 0x1f5   :  { %v926_v60 = vpop.f32.mrf.mxu0 }
 0x1f6   :  { %v931_v61 = vmul.f32 1.442695, %v929_v58  ;;  %v2315_v62 = vpack.c.bf16 %v925_v59, %v921_v57  ;;  %v927_v63 = vadd.f32 %v926_v60, %v803_v51  ;;  %v1126_v51 = vld [vmem:[#allocation4 + $0x40] sm:$0xff] }
 0x1f7   :  { %v2185_v54 = vcombine.high %v1126_v51, %v1130_v52  ;;  %v2184_v56 = vcombine.low %v1126_v51, %v1130_v52  ;;  %v1122_v60 = vld [vmem:[#allocation4 + $0x20] sm:$0xff]  ;;  %v1144_v52 = vld [vmem:[#allocation4 + $0xd0] sm:$0xff] }
 0x1f8   :  { %2554 = vpow2.f32 %v931_v61  ;;  %2316 = vst [vmem:[%s3111_s10] sm:$0xff] %v2315_v62   ;;  %v930_v0 = vmul.f32 0.5, %v927_v63  ;;  %v2320_v1 = vpack.c.bf16 %v927_v63, %v923_v55  ;;  %v1131_v55 = vld [vmem:[#allocation4 + $0x68] sm:$0xff] }
 0x1f9   :  { %v2187_v58 = vcombine.high %v1127_v53, %v1131_v55  ;;  %v1119_v61 = vld [vmem:[#allocation4 + $0x8] sm:$0xff] }
 0x1fa   :  { %v933_v2 = vmul.f32 1.442695, %v930_v0  ;;  %2321 = vst [vmem:[%s3112_s11] sm:$0xff] %v2320_v1   ;;  %v1123_v63 = vld [vmem:[#allocation4 + $0x28] sm:$0xff] }
 0x1fb   :  { %v2178_v1 = vcombine.low %v1119_v61, %v1123_v63 }
 0x1fc   :  { %2556 = vpow2.f32 %v933_v2  ;;  %v2179_v2 = vcombine.high %v1119_v61, %v1123_v63  ;;  %v1140_v61 = vld [vmem:[#allocation4 + $0xb0] sm:$0xff]  ;;  %v1141_v63 = vld [vmem:[#allocation4 + $0xb8] sm:$0xff] }
 0x205   :  { %v2555_v7 = vpop.eup %2554 }
 0x206   :  { %v964_v12 = vmul.f32 %v2555_v7, %v960_v8  ;;  %v966_v13 = vmul.f32 %v2555_v7, %v962_v9  ;;  %v2237_v7 = vcombine.high %v1176_v3, %v1180_v4  ;;  %v1181_v8 = vld [vmem:[#allocation4 + $0x1f8] sm:$0xff]  ;;  %v1128_v4 = vld [vmem:[#allocation4 + $0x50] sm:$0xff] }
 0x207   :  { %v2238_v9 = vcombine.low %v1177_v5, %v1181_v8 }
 0x208   :  { %v968_v17 = vadd.f32 %v964_v12, %v921_v57  ;;  %v970_v19 = vadd.f32 %v966_v13, %v921_v57  ;;  %v2186_v57 = vcombine.low %v1127_v53, %v1131_v55  ;;  %v2167_v13 = vld [vmem:[%s3108_s7] ss:$0 sm:$0xff]  ;;  %v1148_v53 = vld [vmem:[#allocation4 + $0xf0] sm:$0xff]  ;;  %v1149_v55 = vld [vmem:[#allocation4 + $0xf8] sm:$0xff] }
 0x209   :  { %v2557_v14 = vpop.eup %2556 }
 0x20a   :  { %v965_v15 = vmul.f32 %v2557_v14, %v961_v10  ;;  %v967_v16 = vmul.f32 %v2557_v14, %v963_v11  ;;  %v2239_v10 = vcombine.high %v1177_v5, %v1181_v8  ;;  %v1132_v5 = vld [vmem:[#allocation4 + $0x70] sm:$0xff] }
 0x20c   :  { %v969_v18 = vadd.f32 %v965_v15, %v925_v59  ;;  %v971_v20 = vadd.f32 %v967_v16, %v925_v59  ;;  %v1118_v59 = vld [vmem:[#allocation4] sm:$0xff] }
 0x20d   :  { %v2177_v62 = vcombine.high %v1118_v59, %v1122_v60  ;;  %v2176_v0 = vcombine.low %v1118_v59, %v1122_v60  ;;  %v1136_v60 = vld [vmem:[#allocation4 + $0x90] sm:$0xff] }
 0x20e   :  { %v972_v24 = vpack.c.bf16 %v969_v18, %v968_v17  ;;  %v973_v25 = vpack.c.bf16 %v971_v20, %v970_v19  ;;  %v1168_v18 = vld [vmem:[#allocation4 + $0x190] sm:$0xff]  ;;  %v1169_v20 = vld [vmem:[#allocation4 + $0x198] sm:$0xff]  ;;  %v2196_v8 = vcombine.low %v1136_v60, %v1140_v61 }
 0x20f   :  { %v1172_v19 = vld [vmem:[#allocation4 + $0x1b0] sm:$0xff]  ;;  %v2231_v30 = vcombine.high %v1169_v20, %v1173_v21  ;;  %v2230_v37 = vcombine.low %v1169_v20, %v1173_v21 }
 0x210   :  { %2326 = vst [vmem:[%s3113_s12] sm:$0xff] %v972_v24   ;;  %2447 = vmatprep.mubr.bf16.mxu1 %v972_v24  ;;  %2332 = vst [vmem:[%s3113_s12 + $0x8] sm:$0xff] %v973_v25   ;;  %v2229_v28 = vcombine.high %v1168_v18, %v1172_v19 }
 0x211   :  { %2448 = vmatmul.mubr.bf16.vlgmr.msra.gmra.mxu1 %v973_v25 }
 0x212   :  { %1598 = vmatpush1.bf16.msra.mxu1 %v2234_v29  ;;  %1629 = vmatprep.mubr.bf16.mxu1 %v2736_v40  ;;  %v1138_v29 = vld [vmem:[#allocation4 + $0xa0] sm:$0xff] }
 0x213   :  { %1599 = vmatprep.subr.bf16.mxu1 %v2227_v27  ;;  %v2193_v43 = vcombine.high %v1134_v26, %v1138_v29  ;;  %v2192_v45 = vcombine.low %v1134_v26, %v1138_v29  ;;  %v1156_v26 = vld [vmem:[#allocation4 + $0x130] sm:$0xff]  ;;  %v1153_v29 = vld [vmem:[#allocation4 + $0x118] sm:$0xff] }
 0x214   :  { %v2215_v51 = vcombine.high %v1153_v29, %v1157_v42 }
 0x215   :  { %1554 = vmatprep.subr.bf16.mxu0 %v2193_v43 }
 0x216   :  { %1600 = vmatpush1.bf16.msra.mxu1 %v2226_v31  ;;  %1555 = vmatpush1.bf16.msra.mxu0 %v2192_v45  ;;  %v1160_v31 = vld [vmem:[#allocation4 + $0x150] sm:$0xff]  ;;  %v2222_v45 = vcombine.low %v1161_v33, %v1165_v34 }
 0x217   :  { %1601 = vmatprep.subr.bf16.mxu1 %v2219_v32  ;;  %1556 = vmatprep.subr.bf16.mxu0 %v2185_v54  ;;  %v1164_v32 = vld [vmem:[#allocation4 + $0x170] sm:$0xff]  ;;  %v1145_v54 = vld [vmem:[#allocation4 + $0xd8] sm:$0xff] }
 0x218   :  { %v2220_v44 = vcombine.low %v1160_v31, %v1164_v32  ;;  %v2207_v59 = vcombine.high %v1145_v54, %v1149_v55 }
 0x21a   :  { %1602 = vmatpush1.bf16.msra.mxu1 %v2218_v35  ;;  %1557 = vmatpush1.bf16.msra.mxu0 %v2184_v56 }
 0x21b   :  { %1603 = vmatprep.subr.bf16.mxu1 %v2211_v36  ;;  %1558 = vmatprep.subr.bf16.mxu0 %v2177_v62  ;;  %v2228_v36 = vcombine.low %v1168_v18, %v1172_v19  ;;  %v1137_v62 = vld [vmem:[#allocation4 + $0x98] sm:$0xff] }
 0x21c   :  { %v2199_v3 = vcombine.high %v1137_v62, %v1141_v63 }
 0x21e   :  { %1604 = vmatpush1.bf16.msra.mxu1 %v2210_v39  ;;  %1559 = vmatpush1.bf16.msra.mxu0 %v2176_v0  ;;  %v2221_v39 = vcombine.high %v1160_v31, %v1164_v32  ;;  %v2204_v0 = vcombine.low %v1144_v52, %v1148_v53 }
 0x21f   :  { %1605 = vmatprep.subr.bf16.mxu1 %v2203_v41  ;;  %1650 = vmatprep.subr.bf16.mxu0 %v2237_v7  ;;  %v2223_v41 = vcombine.high %v1161_v33, %v1165_v34  ;;  %v1133_v7 = vld [vmem:[#allocation4 + $0x78] sm:$0xff] }
 0x222   :  { %1606 = vmatpush1.bf16.msra.mxu1 %v2202_v23  ;;  %v1152_v23 = vld [vmem:[#allocation4 + $0x110] sm:$0xff] }
 0x223   :  { %1607 = vmatprep.subr.bf16.mxu1 %v2195_v50  ;;  %v2213_v50 = vcombine.high %v1152_v23, %v1156_v26  ;;  %v2212_v56 = vcombine.low %v1152_v23, %v1156_v26 }
 0x226   :  { %1608 = vmatpush1.bf16.msra.mxu1 %v2194_v46 }
 0x227   :  { %1609 = vmatprep.subr.bf16.mxu1 %v2187_v58  ;;  %v2205_v58 = vcombine.high %v1144_v52, %v1148_v53 }
 0x22a   :  { %1610 = vmatpush1.bf16.msra.mxu1 %v2186_v57  ;;  %v2214_v57 = vcombine.low %v1153_v29, %v1157_v42 }
 0x22b   :  { %1611 = vmatprep.subr.bf16.mxu1 %v2179_v2  ;;  %v2197_v2 = vcombine.high %v1136_v60, %v1140_v61 }
 0x22e   :  { %1612 = vmatpush1.bf16.msra.mxu1 %v2178_v1  ;;  %v2206_v1 = vcombine.low %v1145_v54, %v1149_v55 }
 0x22f   :  { %1703 = vmatprep.subr.bf16.mxu1 %v2239_v10  ;;  %v2189_v10 = vcombine.high %v1128_v4, %v1132_v5 }
 0x2d1   :  { %v2449_v11 = vpop.f32.mrf.mxu1 }
 0x2d2   :  { %v1106_v35 = vadd.f32 %v2449_v11, %v2167_v13 }
 0x2d3   :  { %v1097_v12 = vpop.f32.mrf.mxu1 }
 0x2d4   :  { %v1098_v15 = vadd.f32 %v2167_v13, %v1097_v12  ;;  %v1114_v43 = vmax.f32 %v1106_v35, 0.0  ;;  %v1120_v12 = vld [vmem:[#allocation4 + $0x10] sm:$0xff] }
 0x2d5   :  { %v2450_v14 = vpop.f32.mrf.mxu1 }
 0x2d6   :  { %v1112_v22 = vmax.f32 %v1098_v15, 0.0  ;;  %v1109_v25 = vadd.f32 %v2450_v14, %v2167_v13  ;;  %v1121_v14 = vld [vmem:[#allocation4 + $0x18] sm:$0xff] }
 0x2d7   :  { %v1100_v16 = vpop.f32.mrf.mxu1  ;;  %v1125_v15 = vld [vmem:[#allocation4 + $0x38] sm:$0xff] }
 0x2d8   :  { %v1101_v17 = vadd.f32 %v2167_v13, %v1100_v16  ;;  %v1115_v38 = vmax.f32 %v1109_v25, 0.0  ;;  %v1124_v13 = vld [vmem:[#allocation4 + $0x30] sm:$0xff]  ;;  %v2188_v16 = vcombine.low %v1128_v4, %v1132_v5  ;;  %v2183_v19 = vcombine.high %v1121_v14, %v1125_v15 }
 0x2d9   :  { %v2181_v18 = vcombine.high %v1120_v12, %v1124_v13  ;;  %v2180_v20 = vcombine.low %v1120_v12, %v1124_v13  ;;  %v2182_v21 = vcombine.low %v1121_v14, %v1125_v15  ;;  %v1198_v25 = vsub.s32 3, %v2946_v47 }
 0x2da   :  { %v1113_v24 = vmax.f32 %v1101_v17, 0.0  ;;  %v2994_v46 = vpack.c.bf16 %v1115_v38, %v1114_v43 }
 0x2dc   :  { %v2988_v27 = vpack.c.bf16 %v1113_v24, %v1112_v22  ;;  %v1194_v22 = vsub.s32 2, %v2946_v47  ;;  %v3010_v24 = vld [vmem:[%s3110_s9] sm:$0xff] }
 0x2de   :  { %1577 = vmatmul.mubr.bf16.vlgmr.msra.gmra.mxu0 %v2988_v27  ;;  %1630 = vmatmul.mubr.bf16.vlgmr.msra.gmra.mxu1 %v2988_v27 }
 0x2df   :  { %1651 = vmatpush1.bf16.msra.mxu0 %v2236_v6  ;;  %1704 = vmatpush1.bf16.msra.mxu1 %v2238_v9  ;;  %v1129_v6 = vld [vmem:[#allocation4 + $0x58] sm:$0xff]  ;;  %v2198_v9 = vcombine.low %v1137_v62, %v1141_v63 }
 0x2e0   :  { %1652 = vmatprep.subr.bf16.mxu0 %v2229_v28  ;;  %1705 = vmatprep.subr.bf16.mxu1 %v2231_v30  ;;  %v2191_v11 = vcombine.high %v1129_v6, %v1133_v7  ;;  %v2190_v17 = vcombine.low %v1129_v6, %v1133_v7  ;;  %v1195_v28 = vrot.slane %v3010_v24, %v1194_v22 }
 0x2e1   :  { %1586 = vmatprep.mubr.bf16.mxu0 %v2736_v40  ;;  %1639 = vmatprep.mubr.bf16.mxu1 %v2736_v40  ;;  %v1199_v30 = vrot.slane %v3010_v24, %v1198_v25 }
 0x2e3   :  { %1653 = vmatpush1.bf16.msra.mxu0 %v2228_v36  ;;  %1706 = vmatpush1.bf16.msra.mxu1 %v2230_v37 }
 0x2e4   :  { %1654 = vmatprep.subr.bf16.mxu0 %v2221_v39  ;;  %1707 = vmatprep.subr.bf16.mxu1 %v2223_v41 }
 0x2e6   :  { %1587 = vmatmul.mubr.bf16.gmra.mxu0 %v2994_v46  ;;  %1640 = vmatmul.mubr.bf16.gmra.mxu1 %v2994_v46 }
 0x2e7   :  { %1655 = vmatpush1.bf16.msra.mxu0 %v2220_v44  ;;  %1708 = vmatpush1.bf16.msra.mxu1 %v2222_v45 }
 0x2e8   :  { %1656 = vmatprep.subr.bf16.mxu0 %v2213_v50  ;;  %1709 = vmatprep.subr.bf16.mxu1 %v2215_v51 }
 0x2e9   :  { %1682 = vmatprep.mubr.bf16.mxu0 %v2736_v40  ;;  %1735 = vmatprep.mubr.bf16.mxu1 %v2736_v40 }
 0x2eb   :  { %1657 = vmatpush1.bf16.msra.mxu0 %v2212_v56  ;;  %1710 = vmatpush1.bf16.msra.mxu1 %v2214_v57 }
 0x2ec   :  { %1658 = vmatprep.subr.bf16.mxu0 %v2205_v58  ;;  %1711 = vmatprep.subr.bf16.mxu1 %v2207_v59 }
 0x2ef   :  { %1659 = vmatpush1.bf16.msra.mxu0 %v2204_v0  ;;  %1712 = vmatpush1.bf16.msra.mxu1 %v2206_v1 }
 0x2f0   :  { %1660 = vmatprep.subr.bf16.mxu0 %v2197_v2  ;;  %1713 = vmatprep.subr.bf16.mxu1 %v2199_v3 }
 0x2f3   :  { %1661 = vmatpush1.bf16.msra.mxu0 %v2196_v8  ;;  %1714 = vmatpush1.bf16.msra.mxu1 %v2198_v9 }
 0x2f4   :  { %1662 = vmatprep.subr.bf16.mxu0 %v2189_v10  ;;  %1715 = vmatprep.subr.bf16.mxu1 %v2191_v11 }
 0x2f7   :  { %1663 = vmatpush1.bf16.msra.mxu0 %v2188_v16  ;;  %1716 = vmatpush1.bf16.msra.mxu1 %v2190_v17 }
 0x2f8   :  { %1664 = vmatprep.subr.bf16.mxu0 %v2181_v18  ;;  %1717 = vmatprep.subr.bf16.mxu1 %v2183_v19 }
 0x2fb   :  { %1665 = vmatpush1.bf16.msra.mxu0 %v2180_v20  ;;  %1718 = vmatpush1.bf16.msra.mxu1 %v2182_v21 }
 0x2fe   :  { %1683 = vmatmul.mubr.bf16.vlgmr.msra.gmra.mxu0 %v2988_v27  ;;  %1736 = vmatmul.mubr.bf16.vlgmr.msra.gmra.mxu1 %v2988_v27  ;;  %v1187_v27 = vrot.slane %v3010_v24, %v798_v49 }
 0x2ff   :  { %1692 = vmatprep.mubr.bf16.mxu0 %v2736_v40  ;;  %1745 = vmatprep.mubr.bf16.mxu1 %v2736_v40  ;;  %v1191_v40 = vrot.slane %v3010_v24, %v802_v48 }
 0x306   :  { %1693 = vmatmul.mubr.bf16.gmra.mxu0 %v2994_v46  ;;  %1746 = vmatmul.mubr.bf16.gmra.mxu1 %v2994_v46 }
 0x39e   :  { %v1578_v31 = vpop.f32.mrf.mxu0  ;;  %v1631_v32 = vpop.f32.mrf.mxu1 }
 0x39f   :  { %v1579_v33 = vadd.f32 %v1578_v31, %v1187_v27  ;;  %v1632_v34 = vadd.f32 %v1631_v32, %v1195_v28  ;;  %v1202_v32 = vsub.s32 4, %v2946_v47 }
 0x3a0   :  { %v1580_v35 = vpop.f32.mrf.mxu0  ;;  %v1633_v36 = vpop.f32.mrf.mxu1 }
 0x3a1   :  { %v2240_v37 = vmul.f32 -1.442695, %v1579_v33  ;;  %v2242_v38 = vmul.f32 -1.442695, %v1632_v34  ;;  %v1581_v39 = vadd.f32 %v1580_v35, %v1191_v40  ;;  %v1634_v41 = vadd.f32 %v1633_v36, %v1199_v30 }
 0x3a2   :  { %v1582_v23 = vpop.f32.mrf.mxu0  ;;  %v1635_v49 = vpop.f32.mrf.mxu1  ;;  %v1210_v33 = vsub.s32 6, %v2946_v47 }
 0x3a3   :  { %2558 = vpow2.f32 %v2240_v37  ;;  %v2241_v26 = vmul.f32 -1.442695, %v1581_v39  ;;  %v2243_v29 = vmul.f32 -1.442695, %v1634_v41  ;;  %v1583_v42 = vadd.f32 %v1582_v23, %v1187_v27 }
 0x3a4   :  { %2560 = vpow2.f32 %v2242_v38  ;;  %v1636_v48 = vadd.f32 %v1635_v49, %v1195_v28  ;;  %v1584_v43 = vpop.f32.mrf.mxu0  ;;  %v1637_v44 = vpop.f32.mrf.mxu1  ;;  %v1206_v38 = vsub.s32 5, %v2946_v47  ;;  %v1214_v23 = vsub.s32 7, %v2946_v47 }
 0x3a5   :  { %2562 = vpow2.f32 %v2241_v26  ;;  %v2248_v45 = vmul.f32 -1.442695, %v1583_v42  ;;  %v1585_v46 = vadd.f32 %v1584_v43, %v1191_v40  ;;  %v1638_v50 = vadd.f32 %v1637_v44, %v1199_v30 }
 0x3a6   :  { %2564 = vpow2.f32 %v2243_v29  ;;  %v2250_v51 = vmul.f32 -1.442695, %v1636_v48  ;;  %v1588_v52 = vpop.f32.mrf.mxu0  ;;  %v1641_v53 = vpop.f32.mrf.mxu1  ;;  %v3026_v29 = vrot.slane %v3010_v24, %v1202_v32  ;;  %v3029_v42 = vrot.slane %v3010_v24, %v1210_v33 }
 0x3a7   :  { %2566 = vpow2.f32 %v2248_v45  ;;  %v2249_v54 = vmul.f32 -1.442695, %v1585_v46  ;;  %v2251_v55 = vmul.f32 -1.442695, %v1638_v50  ;;  %v1589_v56 = vadd.f32 %v1588_v52, %v1187_v27 }
 0x3a8   :  { %2568 = vpow2.f32 %v2250_v51  ;;  %v1642_v57 = vadd.f32 %v1641_v53, %v1195_v28  ;;  %v1590_v58 = vpop.f32.mrf.mxu0  ;;  %v1643_v59 = vpop.f32.mrf.mxu1  ;;  %v3032_v46 = vrot.slane %v3010_v24, %v1206_v38  ;;  %v3035_v53 = vrot.slane %v3010_v24, %v1214_v23 }
 0x3a9   :  { %2570 = vpow2.f32 %v2249_v54  ;;  %v2256_v60 = vmul.f32 -1.442695, %v1589_v56  ;;  %v1591_v61 = vadd.f32 %v1590_v58, %v1191_v40  ;;  %v1644_v62 = vadd.f32 %v1643_v59, %v1199_v30 }
 0x3aa   :  { %2572 = vpow2.f32 %v2251_v55  ;;  %v2258_v63 = vmul.f32 -1.442695, %v1642_v57  ;;  %v1592_v0 = vpop.f32.mrf.mxu0  ;;  %v1645_v1 = vpop.f32.mrf.mxu1 }
 0x3ab   :  { %2574 = vpow2.f32 %v2256_v60  ;;  %v2257_v2 = vmul.f32 -1.442695, %v1591_v61  ;;  %v2259_v3 = vmul.f32 -1.442695, %v1644_v62  ;;  %v1593_v4 = vadd.f32 %v1592_v0, %v1187_v27 }
 0x3ac   :  { %2576 = vpow2.f32 %v2258_v63  ;;  %v1646_v5 = vadd.f32 %v1645_v1, %v1195_v28  ;;  %v1594_v6 = vpop.f32.mrf.mxu0  ;;  %v1647_v7 = vpop.f32.mrf.mxu1 }
 0x3ad   :  { %2578 = vpow2.f32 %v2257_v2  ;;  %v2264_v8 = vmul.f32 -1.442695, %v1593_v4  ;;  %v1595_v9 = vadd.f32 %v1594_v6, %v1191_v40  ;;  %v1648_v10 = vadd.f32 %v1647_v7, %v1199_v30 }
 0x3ae   :  { %2580 = vpow2.f32 %v2259_v3  ;;  %v2266_v11 = vmul.f32 -1.442695, %v1646_v5 }
 0x3af   :  { %2582 = vpow2.f32 %v2264_v8  ;;  %v2265_v12 = vmul.f32 -1.442695, %v1595_v9  ;;  %v2267_v13 = vmul.f32 -1.442695, %v1648_v10 }
 0x3b0   :  { %v2559_v14 = vpop.eup %2558  ;;  %2584 = vpow2.f32 %v2266_v11 }
 0x3b1   :  { %v2561_v15 = vpop.eup %2560  ;;  %v1852_v16 = vadd.f32 1.0, %v2559_v14  ;;  %2586 = vpow2.f32 %v2265_v12 }
 0x3b2   :  { %v2563_v17 = vpop.eup %2562  ;;  %v1854_v18 = vadd.f32 1.0, %v2561_v15  ;;  %2588 = vpow2.f32 %v2267_v13 }
 0x3b3   :  { %v2565_v19 = vpop.eup %2564  ;;  %2590 = vrcp.f32 %v1852_v16  ;;  %v1853_v20 = vadd.f32 1.0, %v2563_v17 }
 0x3b4   :  { %v2567_v21 = vpop.eup %2566  ;;  %2592 = vrcp.f32 %v1854_v18  ;;  %v1855_v22 = vadd.f32 1.0, %v2565_v19 }
 0x3b5   :  { %v2569_v25 = vpop.eup %2568  ;;  %2594 = vrcp.f32 %v1853_v20  ;;  %v1860_v27 = vadd.f32 1.0, %v2567_v21 }
 0x3b6   :  { %v2571_v28 = vpop.eup %2570  ;;  %2596 = vrcp.f32 %v1855_v22  ;;  %v1862_v40 = vadd.f32 1.0, %v2569_v25 }
 0x3b7   :  { %v2573_v30 = vpop.eup %2572  ;;  %2598 = vrcp.f32 %v1860_v27  ;;  %v1861_v31 = vadd.f32 1.0, %v2571_v28 }
 0x3b8   :  { %v2575_v34 = vpop.eup %2574  ;;  %2600 = vrcp.f32 %v1862_v40  ;;  %v1863_v35 = vadd.f32 1.0, %v2573_v30 }
 0x3b9   :  { %v2577_v36 = vpop.eup %2576  ;;  %2602 = vrcp.f32 %v1861_v31  ;;  %v1868_v37 = vadd.f32 1.0, %v2575_v34 }
 0x3ba   :  { %v2579_v39 = vpop.eup %2578  ;;  %2604 = vrcp.f32 %v1863_v35  ;;  %v1870_v41 = vadd.f32 1.0, %v2577_v36 }
 0x3bb   :  { %v2581_v49 = vpop.eup %2580  ;;  %2606 = vrcp.f32 %v1868_v37  ;;  %v1869_v26 = vadd.f32 1.0, %v2579_v39 }
 0x3bc   :  { %v2583_v48 = vpop.eup %2582  ;;  %2608 = vrcp.f32 %v1870_v41  ;;  %v1871_v43 = vadd.f32 1.0, %v2581_v49 }
 0x3bd   :  { %v2585_v44 = vpop.eup %2584  ;;  %2610 = vrcp.f32 %v1869_v26  ;;  %v1876_v45 = vadd.f32 1.0, %v2583_v48 }
 0x3be   :  { %v2587_v50 = vpop.eup %2586  ;;  %2612 = vrcp.f32 %v1871_v43  ;;  %v1878_v47 = vadd.f32 1.0, %v2585_v44  ;;  %v1684_v51 = vpop.f32.mrf.mxu0 }
 0x3bf   :  { %v1737_v52 = vpop.f32.mrf.mxu1  ;;  %v2589_v54 = vpop.eup %2588  ;;  %2614 = vrcp.f32 %v1876_v45  ;;  %v1877_v55 = vadd.f32 1.0, %v2587_v50  ;;  %v1685_v56 = vadd.f32 %v1684_v51, %v3026_v29 }
 0x3c0   :  { %v1738_v57 = vadd.f32 %v1737_v52, %v3029_v42  ;;  %v2591_v58 = vpop.eup %2590  ;;  %2616 = vrcp.f32 %v1878_v47  ;;  %v1879_v59 = vadd.f32 1.0, %v2589_v54  ;;  %v1686_v60 = vpop.f32.mrf.mxu0 }
 0x3c1   :  { %v1739_v61 = vpop.f32.mrf.mxu1  ;;  %v2593_v62 = vpop.eup %2592  ;;  %2618 = vrcp.f32 %v1877_v55  ;;  %v2244_v63 = vmul.f32 -1.442695, %v1685_v56  ;;  %v1687_v1 = vadd.f32 %v1686_v60, %v3032_v46 }
 0x3c2   :  { %v2246_v0 = vmul.f32 -1.442695, %v1738_v57  ;;  %v2595_v24 = vpop.eup %2594  ;;  %2620 = vrcp.f32 %v1879_v59  ;;  %v1740_v2 = vadd.f32 %v1739_v61, %v3035_v53  ;;  %v1688_v3 = vpop.f32.mrf.mxu0 }
 0x3c3   :  { %v1741_v4 = vpop.f32.mrf.mxu1  ;;  %v2597_v5 = vpop.eup %2596  ;;  %v2296_v6 = vpack.c.bf16 %v2595_v24, %v2591_v58  ;;  %2622 = vpow2.f32 %v2244_v63  ;;  %v2245_v7 = vmul.f32 -1.442695, %v1687_v1  ;;  %v1689_v8 = vadd.f32 %v1688_v3, %v3026_v29 }
 0x3c4   :  { %v2599_v9 = vpop.eup %2598  ;;  %v2297_v10 = vpack.c.bf16 %v2597_v5, %v2593_v62  ;;  %2624 = vpow2.f32 %v2246_v0  ;;  %v2247_v11 = vmul.f32 -1.442695, %v1740_v2  ;;  %v1742_v12 = vadd.f32 %v1741_v4, %v3029_v42  ;;  %v1690_v13 = vpop.f32.mrf.mxu0 }
 0x3c5   :  { %v1743_v14 = vpop.f32.mrf.mxu1  ;;  %v2601_v15 = vpop.eup %2600  ;;  %2044 = vst [vmem:[%s3114_s13] sm:$0xff] %v2296_v6  ;;  %2626 = vpow2.f32 %v2245_v7  ;;  %v2252_v16 = vmul.f32 -1.442695, %v1689_v8  ;;  %v1691_v17 = vadd.f32 %v1690_v13, %v3032_v46 }
 0x3c6   :  { %v1744_v18 = vadd.f32 %v1743_v14, %v3035_v53  ;;  %v2603_v19 = vpop.eup %2602  ;;  %2045 = vst [vmem:[%s3114_s13 + $0x8] sm:$0xff] %v2297_v10  ;;  %2628 = vpow2.f32 %v2247_v11  ;;  %v2254_v20 = vmul.f32 -1.442695, %v1742_v12  ;;  %v1694_v21 = vpop.f32.mrf.mxu0 }
 0x3c7   :  { %v1747_v22 = vpop.f32.mrf.mxu1  ;;  %v2605_v25 = vpop.eup %2604  ;;  %v2300_v27 = vpack.c.bf16 %v2603_v19, %v2599_v9  ;;  %2630 = vpow2.f32 %v2252_v16  ;;  %v2253_v28 = vmul.f32 -1.442695, %v1691_v17  ;;  %v1695_v32 = vadd.f32 %v1694_v21, %v3026_v29 }
 0x3c8   :  { %v2255_v40 = vmul.f32 -1.442695, %v1744_v18  ;;  %v2607_v30 = vpop.eup %2606  ;;  %v2301_v31 = vpack.c.bf16 %v2605_v25, %v2601_v15  ;;  %2632 = vpow2.f32 %v2254_v20  ;;  %v1748_v33 = vadd.f32 %v1747_v22, %v3029_v42  ;;  %v1696_v34 = vpop.f32.mrf.mxu0 }
 0x3c9   :  { %v1749_v35 = vpop.f32.mrf.mxu1  ;;  %v2609_v36 = vpop.eup %2608  ;;  %2048 = vst [vmem:[%s3114_s13 + $0x20] sm:$0xff] %v2300_v27  ;;  %2634 = vpow2.f32 %v2253_v28  ;;  %v1697_v37 = vadd.f32 %v1696_v34, %v3032_v46  ;;  %v2260_v41 = vmul.f32 -1.442695, %v1695_v32 }
 0x3ca   :  { %v1750_v38 = vadd.f32 %v1749_v35, %v3035_v53  ;;  %v2611_v39 = vpop.eup %2610  ;;  %2049 = vst [vmem:[%s3114_s13 + $0x28] sm:$0xff] %v2301_v31  ;;  %2636 = vpow2.f32 %v2255_v40  ;;  %v2262_v23 = vmul.f32 -1.442695, %v1748_v33  ;;  %v1698_v49 = vpop.f32.mrf.mxu0 }
 0x3cb   :  { %v1751_v26 = vpop.f32.mrf.mxu1  ;;  %v2613_v48 = vpop.eup %2612  ;;  %v2304_v43 = vpack.c.bf16 %v2611_v39, %v2607_v30  ;;  %v2261_v44 = vmul.f32 -1.442695, %v1697_v37  ;;  %v1699_v50 = vadd.f32 %v1698_v49, %v3026_v29  ;;  %2638 = vpow2.f32 %v2260_v41 }
 0x3cc   :  { %v2263_v45 = vmul.f32 -1.442695, %v1750_v38  ;;  %v2615_v47 = vpop.eup %2614  ;;  %v2305_v51 = vpack.c.bf16 %v2613_v48, %v2609_v36  ;;  %v1752_v52 = vadd.f32 %v1751_v26, %v3029_v42  ;;  %v1700_v54 = vpop.f32.mrf.mxu0  ;;  %2640 = vpow2.f32 %v2262_v23 }
 0x3cd   :  { %v2617_v55 = vpop.eup %2616  ;;  %2052 = vst [vmem:[%s3114_s13 + $0x40] sm:$0xff] %v2304_v43  ;;  %v2268_v56 = vmul.f32 -1.442695, %v1699_v50  ;;  %v1701_v57 = vadd.f32 %v1700_v54, %v3032_v46  ;;  %2642 = vpow2.f32 %v2261_v44  ;;  %v1753_v63 = vpop.f32.mrf.mxu1 }
 0x3ce   :  { %v2619_v58 = vpop.eup %2618  ;;  %2053 = vst [vmem:[%s3114_s13 + $0x48] sm:$0xff] %v2305_v51  ;;  %v2270_v29 = vmul.f32 -1.442695, %v1752_v52  ;;  %2644 = vpow2.f32 %v2263_v45  ;;  %v1754_v4 = vadd.f32 %v1753_v63, %v3035_v53 }
 0x3cf   :  { %v2621_v59 = vpop.eup %2620  ;;  %v2308_v60 = vpack.c.bf16 %v2619_v58, %v2615_v47  ;;  %v2269_v42 = vmul.f32 -1.442695, %v1701_v57  ;;  %2646 = vpow2.f32 %v2268_v56 }
 0x3d0   :  { %v2623_v61 = vpop.eup %2622  ;;  %v2309_v62 = vpack.c.bf16 %v2621_v59, %v2617_v55  ;;  %2648 = vpow2.f32 %v2270_v29  ;;  %v2271_v13 = vmul.f32 -1.442695, %v1754_v4 }
 0x3d1   :  { %v2625_v0 = vpop.eup %2624  ;;  %2056 = vst [vmem:[%s3114_s13 + $0x60] sm:$0xff] %v2308_v60  ;;  %v1856_v46 = vadd.f32 1.0, %v2623_v61  ;;  %2650 = vpow2.f32 %v2269_v42 }
 0x3d2   :  { %v2627_v1 = vpop.eup %2626  ;;  %2057 = vst [vmem:[%s3114_s13 + $0x68] sm:$0xff] %v2309_v62  ;;  %v1858_v24 = vadd.f32 1.0, %v2625_v0 }
 0x3d3   :  { %v2629_v2 = vpop.eup %2628  ;;  %2652 = vrcp.f32 %v1856_v46  ;;  %v1857_v3 = vadd.f32 1.0, %v2627_v1 }
 0x3d4   :  { %v2631_v5 = vpop.eup %2630  ;;  %2654 = vrcp.f32 %v1858_v24  ;;  %v1859_v6 = vadd.f32 1.0, %v2629_v2 }
 0x3d5   :  { %v2633_v7 = vpop.eup %2632  ;;  %2656 = vrcp.f32 %v1857_v3  ;;  %v1864_v8 = vadd.f32 1.0, %v2631_v5 }
 0x3d6   :  { %v2635_v9 = vpop.eup %2634  ;;  %2658 = vrcp.f32 %v1859_v6  ;;  %v1866_v10 = vadd.f32 1.0, %v2633_v7 }
 0x3d7   :  { %v2637_v11 = vpop.eup %2636  ;;  %2660 = vrcp.f32 %v1864_v8  ;;  %v1865_v12 = vadd.f32 1.0, %v2635_v9 }
 0x3d8   :  { %2662 = vrcp.f32 %v1866_v10  ;;  %v1867_v14 = vadd.f32 1.0, %v2637_v11  ;;  %v2639_v15 = vpop.eup %2638 }
 0x3d9   :  { %2664 = vrcp.f32 %v1865_v12  ;;  %v2641_v16 = vpop.eup %2640  ;;  %v1872_v53 = vadd.f32 1.0, %v2639_v15 }
 0x3da   :  { %2666 = vrcp.f32 %v1867_v14  ;;  %v2643_v17 = vpop.eup %2642  ;;  %v1874_v18 = vadd.f32 1.0, %v2641_v16 }
 0x3db   :  { %2668 = vpow2.f32 %v2271_v13  ;;  %v2645_v19 = vpop.eup %2644  ;;  %v1873_v20 = vadd.f32 1.0, %v2643_v17 }
 0x3dc   :  { %2670 = vrcp.f32 %v1872_v53  ;;  %v2647_v21 = vpop.eup %2646  ;;  %v1875_v22 = vadd.f32 1.0, %v2645_v19 }
 0x3dd   :  { %2672 = vrcp.f32 %v1874_v18  ;;  %v2649_v25 = vpop.eup %2648  ;;  %v1880_v27 = vadd.f32 1.0, %v2647_v21 }
 0x3de   :  { %2674 = vrcp.f32 %v1873_v20  ;;  %v2651_v28 = vpop.eup %2650  ;;  %v1882_v39 = vadd.f32 1.0, %v2649_v25 }
 0x3df   :  { %2676 = vrcp.f32 %v1875_v22  ;;  %v1881_v30 = vadd.f32 1.0, %v2651_v28 }
 0x3e0   :  { %v2653_v40 = vpop.eup %2652  ;;  %2678 = vrcp.f32 %v1880_v27 }
 0x3e1   :  { %v2655_v31 = vpop.eup %2654  ;;  %2680 = vrcp.f32 %v1881_v30 }
 0x3e2   :  { %v2657_v32 = vpop.eup %2656  ;;  %2682 = vrcp.f32 %v1882_v39 }
 0x3e3   :  { %v2659_v33 = vpop.eup %2658  ;;  %v2298_v34 = vpack.c.bf16 %v2657_v32, %v2653_v40 }
 0x3e4   :  { %v2661_v35 = vpop.eup %2660  ;;  %v2299_v36 = vpack.c.bf16 %v2659_v33, %v2655_v31 }
 0x3e5   :  { %v2663_v37 = vpop.eup %2662  ;;  %2046 = vst [vmem:[%s3114_s13 + $0x10] sm:$0xff] %v2298_v34 }
 0x3e6   :  { %v2665_v38 = vpop.eup %2664  ;;  %2047 = vst [vmem:[%s3114_s13 + $0x18] sm:$0xff] %v2299_v36 }
 0x3e7   :  { %v2667_v41 = vpop.eup %2666  ;;  %v2302_v23 = vpack.c.bf16 %v2665_v38, %v2661_v35 }
 0x3e8   :  { %v2669_v49 = vpop.eup %2668  ;;  %v2303_v26 = vpack.c.bf16 %v2667_v41, %v2663_v37 }
 0x3e9   :  { %v2671_v48 = vpop.eup %2670  ;;  %2050 = vst [vmem:[%s3114_s13 + $0x30] sm:$0xff] %v2302_v23  ;;  %v1883_v43 = vadd.f32 1.0, %v2669_v49 }
 0x3ea   :  { %v2673_v44 = vpop.eup %2672  ;;  %2051 = vst [vmem:[%s3114_s13 + $0x38] sm:$0xff] %v2303_v26 }
 0x3eb   :  { %v2675_v45 = vpop.eup %2674  ;;  %2684 = vrcp.f32 %v1883_v43 }
 0x3ec   :  { %v2677_v50 = vpop.eup %2676  ;;  %v2306_v47 = vpack.c.bf16 %v2675_v45, %v2671_v48 }
 0x3ed   :  { %v2307_v51 = vpack.c.bf16 %v2677_v50, %v2673_v44  ;;  %v2679_v52 = vpop.eup %2678 }
 0x3ee   :  { %2054 = vst [vmem:[%s3114_s13 + $0x50] sm:$0xff] %v2306_v47  ;;  %v2681_v54 = vpop.eup %2680 }
 0x3ef   :  { %2055 = vst [vmem:[%s3114_s13 + $0x58] sm:$0xff] %v2307_v51  ;;  %v2310_v55 = vpack.c.bf16 %v2681_v54, %v2679_v52  ;;  %v2683_v56 = vpop.eup %2682 }
 0x3f1   :  { %2058 = vst [vmem:[%s3114_s13 + $0x70] sm:$0xff] %v2310_v55 }
 0x3f8   :  { %v2685_v57 = vpop.eup %2684 }
 0x3f9   :  { %v2311_v58 = vpack.c.bf16 %v2685_v57, %v2683_v56 }
 0x3fb   :  { %2059 = vst [vmem:[%s3114_s13 + $0x78] sm:$0xff] %v2311_v58 }
 0x3fc   :  { %2076 = vsyncpa [#allocation3], 1 }
 0x3fd   :  { %2077 = vsyncpa [#allocation5], 1 }

</bundles_post_ra>
